<compile_context>
chip_gen: v5e
topology: v5e:2x2
jax: 0.10.0
libtpu: 0.0.40
codegen_flags: <defaults>
</compile_context>

<pallas_src>
import functools

import jax
import jax.numpy as jnp
from jax import lax
from jax.experimental import pallas as pl
from jax.experimental.pallas import tpu as pltpu


def _round_up(x, m):
    return (x + m - 1) // m * m


def _gru_fused_kernel(x_ref, h0_ref, wih_ref, whh_ref, bi_ref, bhn_ref,
                      wout_ref, bout_ref, out_ref, hn_ref, gi_scr, hs_scr,
                      *, seq_len, batch_pad, hidden_pad):
    """Whole-sequence fused GRU + Linear (eval mode).

    x_ref   : (T*Bp, Ip)   time-major, batch/feature padded input
    h0_ref  : (Bp, Hp)     initial hidden
    wih_ref : (Ip, 3*Hp)   [W_ir^T | W_iz^T | W_in^T], gate blocks 128-aligned
    whh_ref : (Hp, 3*Hp)   [W_hr^T | W_hz^T | W_hn^T]
    bi_ref  : (1, 3*Hp)    [b_ir+b_hr | b_iz+b_hz | b_in]
    bhn_ref : (1, Hp)      b_hn (must stay inside r * (.))
    wout_ref: (Hp, Ip)     W_out^T
    bout_ref: (1, Ip)      b_out
    out_ref : (T*Bp, Ip)   per-step output after the Linear
    hn_ref  : (Bp, Hp)     final hidden state
    gi_scr  : (T*Bp, 3*Hp) precomputed input-side gate pre-activations
    hs_scr  : (T*Bp, Hp)   hidden state for every step
    """
    T, Bp, Hp = seq_len, batch_pad, hidden_pad

    # 1) Input projection for ALL time steps in one matmul (off the serial path).
    gi_scr[...] = jnp.dot(x_ref[...], wih_ref[...],
                          preferred_element_type=jnp.float32) + bi_ref[...]

    # Hoisted broadcast (JAX does not CSE broadcast_in_dim inside loops).
    bhn = jnp.broadcast_to(bhn_ref[...], (Bp, Hp))

    # 2) Serial recurrence over time: one small h-dependent matmul per step.
    def step(t, h):
        base = t * Bp                                        # sublane-aligned (Bp = 8k)
        gi = gi_scr[pl.ds(base, Bp), :]                      # (Bp, 3*Hp)
        gh = jnp.dot(h, whh_ref[...],
                     preferred_element_type=jnp.float32)     # (Bp, 3*Hp)
        # Gate blocks are at 128-aligned lane offsets -> whole-vreg slices.
        r = jax.nn.sigmoid(gi[:, 0:Hp] + gh[:, 0:Hp])
        z = jax.nn.sigmoid(gi[:, Hp:2 * Hp] + gh[:, Hp:2 * Hp])
        n = jnp.tanh(gi[:, 2 * Hp:] + r * (gh[:, 2 * Hp:] + bhn))
        h_new = (1.0 - z) * n + z * h
        hs_scr[pl.ds(base, Bp), :] = h_new
        return h_new

    h_last = lax.fori_loop(0, T, step, h0_ref[...], unroll=True)
    hn_ref[...] = h_last

    # 3) Dropout(p=0.2) is the identity in eval mode; output Linear for all
    #    steps as one lane-dense matmul + unmasked store.
    # TODO(synk): training-mode stochastic Dropout would use pltpu.prng_seed /
    #             pltpu.prng_random_bits; eval-mode identity is implemented.
    out_ref[...] = (jnp.dot(hs_scr[...], wout_ref[...],
                            preferred_element_type=jnp.float32)
                    + bout_ref[...]).astype(out_ref.dtype)


def encoder_rnn_numerical_forward(x, hidden, params):
    """Forward pass matching EncoderRNNNumerical.forward (eval mode).

    x:      (B, T, input_size)   batch_first, like torch
    hidden: (1, B, hidden_size)
    returns (output, hidden_out):
        output:     (B, T, input_size)
        hidden_out: (1, B, hidden_size)
    """
    B, T, I = x.shape
    H = hidden.shape[-1]
    Bp = _round_up(B, 8)       # sublane-full
    Ip = _round_up(I, 128)     # lane-dense
    Hp = _round_up(H, 128)     # lane-dense

    f32 = jnp.float32
    w_ih = params["w_ih"].astype(f32)    # (3H, I)   gates [r; z; n]
    w_hh = params["w_hh"].astype(f32)    # (3H, H)
    b_ih = params["b_ih"].astype(f32)    # (3H,)
    b_hh = params["b_hh"].astype(f32)    # (3H,)
    w_out = params["w_out"].astype(f32)  # (I, H)
    b_out = params["b_out"].astype(f32)  # (I,)

    def pad2(a, rows, cols):
        return jnp.zeros((rows, cols), f32).at[:a.shape[0], :a.shape[1]].set(a)

    def pad_gates_t(w, in_pad):
        # w: (3H, in_dim) stacked [r; z; n] -> (in_pad, 3*Hp), each gate block
        # transposed and placed at a 128-aligned lane offset.
        blocks = [pad2(w[g * H:(g + 1) * H, :].T, in_pad, Hp) for g in range(3)]
        return jnp.concatenate(blocks, axis=1)

    wih_p = pad_gates_t(w_ih, Ip)                             # (Ip, 3*Hp)
    whh_p = pad_gates_t(w_hh, Hp)                             # (Hp, 3*Hp)

    def pad_row(v):
        return jnp.zeros((1, Hp), f32).at[0, :H].set(v)

    # Pre-combined biases (b_in / b_hn kept separate because of r * (. + b_hn)).
    b_r = pad_row(b_ih[0:H] + b_hh[0:H])
    b_z = pad_row(b_ih[H:2 * H] + b_hh[H:2 * H])
    b_in = pad_row(b_ih[2 * H:3 * H])
    bi = jnp.concatenate([b_r, b_z, b_in], axis=1)            # (1, 3*Hp)
    bhn = pad_row(b_hh[2 * H:3 * H])                          # (1, Hp)

    wout_p = pad2(w_out.T, Hp, Ip)                            # (Hp, Ip)
    bout_p = jnp.zeros((1, Ip), f32).at[0, :I].set(b_out)     # (1, Ip)

    # Time-major, padded, flattened so the kernel only sees 2-D lane-dense tiles.
    x_tbi = jnp.transpose(x.astype(f32), (1, 0, 2))           # (T, B, I)
    x_p = (jnp.zeros((T, Bp, Ip), f32).at[:, :B, :I].set(x_tbi)
           .reshape(T * Bp, Ip))
    h0_p = jnp.zeros((Bp, Hp), f32).at[:B, :H].set(hidden[0].astype(f32))

    kernel = functools.partial(_gru_fused_kernel, seq_len=T,
                               batch_pad=Bp, hidden_pad=Hp)
    vmem = pl.BlockSpec(memory_space=pltpu.MemorySpace.VMEM)

    out2, hn_p = pl.pallas_call(
        kernel,
        out_shape=(jax.ShapeDtypeStruct((T * Bp, Ip), f32),
                   jax.ShapeDtypeStruct((Bp, Hp), f32)),
        in_specs=[vmem] * 8,
        out_specs=(vmem, vmem),
        scratch_shapes=[pltpu.VMEM((T * Bp, 3 * Hp), f32),   # gi (input gates)
                        pltpu.VMEM((T * Bp, Hp), f32)],      # hs (hidden states)
    )(x_p, h0_p, wih_p, whh_p, bi, bhn, wout_p, bout_p)

    out = jnp.transpose(out2.reshape(T, Bp, Ip)[:, :B, :I], (1, 0, 2))  # (B,T,I)
    hn = hn_p[:B, :H][None]                                             # (1,B,H)
    return out, hn


def _reference_forward(x, hidden, params):
    """Pure-JAX reference (lax.scan) mirroring torch.nn.GRU + Linear, eval mode."""
    w_ih, w_hh, b_ih, b_hh, w_out, b_out = (
        params["w_ih"], params["w_hh"], params["b_ih"],
        params["b_hh"], params["w_out"], params["b_out"])
    H = hidden.shape[-1]

    def step(h, x_t):
        gi = x_t @ w_ih.T + b_ih
        gh = h @ w_hh.T + b_hh
        i_r, i_z, i_n = gi[:, :H], gi[:, H:2 * H], gi[:, 2 * H:]
        h_r, h_z, h_n = gh[:, :H], gh[:, H:2 * H], gh[:, 2 * H:]
        r = jax.nn.sigmoid(i_r + h_r)
        z = jax.nn.sigmoid(i_z + h_z)
        n = jnp.tanh(i_n + r * h_n)
        h_new = (1.0 - z) * n + z * h
        return h_new, h_new

    x_tbi = jnp.transpose(x, (1, 0, 2))                       # (T, B, I)
    h_last, hs = lax.scan(step, hidden[0], x_tbi)             # hs: (T, B, H)
    out = hs @ w_out.T + b_out                                # dropout = identity
    return jnp.transpose(out, (1, 0, 2)), h_last[None]


def _init_params(key, input_size, hidden_size):
    """Deterministic parameter init with shapes matching nn.GRU / nn.Linear."""
    ks = jax.random.split(key, 6)
    s = 1.0 / jnp.sqrt(hidden_size)
    u = lambda k, shape: jax.random.uniform(k, shape, jnp.float32, -s, s)
    return {
        "w_ih": u(ks[0], (3 * hidden_size, input_size)),   # gru.weight_ih_l0
        "w_hh": u(ks[1], (3 * hidden_size, hidden_size)),  # gru.weight_hh_l0
        "b_ih": u(ks[2], (3 * hidden_size,)),              # gru.bias_ih_l0
        "b_hh": u(ks[3], (3 * hidden_size,)),              # gru.bias_hh_l0
        "w_out": u(ks[4], (input_size, hidden_size)),      # out.weight
        "b_out": u(ks[5], (input_size,)),                  # out.bias
    }


if __name__ == "__main__":
    B, T, INPUT_SIZE, HIDDEN_SIZE = 2, 8, 4, 32

    key = jax.random.PRNGKey(0)
    k_x, k_p = jax.random.split(key)
    x = jax.random.normal(k_x, (B, T, INPUT_SIZE), jnp.float32)
    hidden0 = jnp.zeros((1, B, HIDDEN_SIZE), jnp.float32)   # initHidden, batched
    params = _init_params(k_p, INPUT_SIZE, HIDDEN_SIZE)

    out, hn = jax.jit(encoder_rnn_numerical_forward)(x, hidden0, params)
    out, hn = jax.block_until_ready(out), jax.block_until_ready(hn)

    out_ref, hn_ref = _reference_forward(x, hidden0, params)
    assert out.shape == (B, T, INPUT_SIZE) and hn.shape == (1, B, HIDDEN_SIZE)
    assert jnp.allclose(out, out_ref, atol=2e-5, rtol=2e-5)
    assert jnp.allclose(hn, hn_ref, atol=2e-5, rtol=2e-5)

    print("KERNEL_OK")
</pallas_src>

<mosaic_0001>
module attributes {stable_mosaic.version = 11 : i64} {
  func.func @_gru_fused_kernel(%arg0: memref<64x128xf32, #tpu.memory_space<vmem>>, %arg1: memref<8x128xf32, #tpu.memory_space<vmem>>, %arg2: memref<128x384xf32, #tpu.memory_space<vmem>>, %arg3: memref<128x384xf32, #tpu.memory_space<vmem>>, %arg4: memref<1x384xf32, #tpu.memory_space<vmem>>, %arg5: memref<1x128xf32, #tpu.memory_space<vmem>>, %arg6: memref<128x128xf32, #tpu.memory_space<vmem>>, %arg7: memref<1x128xf32, #tpu.memory_space<vmem>>, %arg8: memref<64x128xf32, #tpu.memory_space<vmem>>, %arg9: memref<8x128xf32, #tpu.memory_space<vmem>>, %arg10: memref<64x384xf32, #tpu.memory_space<vmem>>, %arg11: memref<64x128xf32, #tpu.memory_space<vmem>>) attributes {dimension_semantics = [], scalar_prefetch = 0 : i64, scratch_operands = 2 : i64, tpu.core_type = #tpu.core_type<tc>} {
    %c0 = arith.constant 0 : index
    %c0_0 = arith.constant 0 : index
    %0 = vector.load %arg0[%c0, %c0_0] : memref<64x128xf32, #tpu.memory_space<vmem>>, vector<64x128xf32>
    %c0_1 = arith.constant 0 : index
    %c0_2 = arith.constant 0 : index
    %1 = vector.load %arg2[%c0_1, %c0_2] : memref<128x384xf32, #tpu.memory_space<vmem>>, vector<128x384xf32>
    %cst = arith.constant dense<0.000000e+00> : vector<64x384xf32>
    %2 = tpu.matmul %0, %1, %cst {dimension_numbers = #tpu.dot_dimension_numbers<[1], [0], [0], [1], [0, 0, 1, 1], [], []>} : vector<64x128xf32>, vector<128x384xf32>, vector<64x384xf32> -> vector<64x384xf32>
    %c0_3 = arith.constant 0 : index
    %c0_4 = arith.constant 0 : index
    %3 = vector.load %arg4[%c0_3, %c0_4] : memref<1x384xf32, #tpu.memory_space<vmem>>, vector<1x384xf32>
    %4 = vector.broadcast %3 : vector<1x384xf32> to vector<64x384xf32>
    %5 = arith.addf %2, %4 : vector<64x384xf32>
    %c0_5 = arith.constant 0 : index
    %c0_6 = arith.constant 0 : index
    %6 = vector.load %arg10[%c0_5, %c0_6] : memref<64x384xf32, #tpu.memory_space<vmem>>, vector<64x384xf32>
    tpu.vector_store %arg10[%c0_5, %c0_6], %5 {strides = array<i32>} : memref<64x384xf32, #tpu.memory_space<vmem>>, vector<64x384xf32>,
    %c0_7 = arith.constant 0 : index
    %c0_8 = arith.constant 0 : index
    %7 = vector.load %arg5[%c0_7, %c0_8] : memref<1x128xf32, #tpu.memory_space<vmem>>, vector<1x128xf32>
    %8 = vector.shape_cast %7 : vector<1x128xf32> to vector<1x128xf32>
    %9 = vector.broadcast %8 : vector<1x128xf32> to vector<8x128xf32>
    %c0_9 = arith.constant 0 : index
    %c0_10 = arith.constant 0 : index
    %10 = vector.load %arg1[%c0_9, %c0_10] : memref<8x128xf32, #tpu.memory_space<vmem>>, vector<8x128xf32>
    %c0_i32 = arith.constant 0 : i32
    %c8_i32 = arith.constant 8 : i32
    %11 = arith.muli %c0_i32, %c8_i32 : i32
    %12 = arith.index_cast %11 : i32 to index
    %c0_11 = arith.constant 0 : index
    %13 = vector.load %arg10[%12, %c0_11] : memref<64x384xf32, #tpu.memory_space<vmem>>, vector<8x384xf32>
    %c0_12 = arith.constant 0 : index
    %c0_13 = arith.constant 0 : index
    %14 = vector.load %arg3[%c0_12, %c0_13] : memref<128x384xf32, #tpu.memory_space<vmem>>, vector<128x384xf32>
    %cst_14 = arith.constant dense<0.000000e+00> : vector<8x384xf32>
    %15 = tpu.matmul %10, %14, %cst_14 {dimension_numbers = #tpu.dot_dimension_numbers<[1], [0], [0], [1], [0, 0, 1, 1], [], []>} : vector<8x128xf32>, vector<128x384xf32>, vector<8x384xf32> -> vector<8x384xf32>
    %16 = vector.extract_strided_slice %13 {offsets = [0, 0], sizes = [8, 128], strides = [1, 1]} : vector<8x384xf32> to vector<8x128xf32>
    %17 = vector.extract_strided_slice %15 {offsets = [0, 0], sizes = [8, 128], strides = [1, 1]} : vector<8x384xf32> to vector<8x128xf32>
    %18 = arith.addf %16, %17 : vector<8x128xf32>
    %19 = arith.negf %18 : vector<8x128xf32>
    %20 = math.exp %19 : vector<8x128xf32>
    %cst_15 = arith.constant 1.000000e+00 : f32
    %21 = vector.broadcast %cst_15 : f32 to vector<8x128xf32>
    %22 = arith.addf %21, %20 : vector<8x128xf32>
    %23 = arith.divf %21, %22 : vector<8x128xf32>
    %24 = vector.extract_strided_slice %13 {offsets = [0, 128], sizes = [8, 128], strides = [1, 1]} : vector<8x384xf32> to vector<8x128xf32>
    %25 = vector.extract_strided_slice %15 {offsets = [0, 128], sizes = [8, 128], strides = [1, 1]} : vector<8x384xf32> to vector<8x128xf32>
    %26 = arith.addf %24, %25 : vector<8x128xf32>
    %27 = arith.negf %26 : vector<8x128xf32>
    %28 = math.exp %27 : vector<8x128xf32>
    %cst_16 = arith.constant 1.000000e+00 : f32
    %29 = vector.broadcast %cst_16 : f32 to vector<8x128xf32>
    %30 = arith.addf %29, %28 : vector<8x128xf32>
    %31 = arith.divf %29, %30 : vector<8x128xf32>
    %32 = vector.extract_strided_slice %13 {offsets = [0, 256], sizes = [8, 128], strides = [1, 1]} : vector<8x384xf32> to vector<8x128xf32>
    %33 = vector.extract_strided_slice %15 {offsets = [0, 256], sizes = [8, 128], strides = [1, 1]} : vector<8x384xf32> to vector<8x128xf32>
    %34 = arith.addf %33, %9 : vector<8x128xf32>
    %35 = arith.mulf %23, %34 : vector<8x128xf32>
    %36 = arith.addf %32, %35 : vector<8x128xf32>
    %37 = math.tanh %36 : vector<8x128xf32>
    %cst_17 = arith.constant 1.000000e+00 : f32
    %38 = vector.broadcast %cst_17 : f32 to vector<8x128xf32>
    %39 = arith.subf %38, %31 : vector<8x128xf32>
    %40 = arith.mulf %39, %37 : vector<8x128xf32>
    %41 = arith.mulf %31, %10 : vector<8x128xf32>
    %42 = arith.addf %40, %41 : vector<8x128xf32>
    %43 = arith.index_cast %11 : i32 to index
    %c0_18 = arith.constant 0 : index
    %44 = vector.load %arg11[%43, %c0_18] : memref<64x128xf32, #tpu.memory_space<vmem>>, vector<8x128xf32>
    tpu.vector_store %arg11[%43, %c0_18], %42 {strides = array<i32>} : memref<64x128xf32, #tpu.memory_space<vmem>>, vector<8x128xf32>,
    %c1_i32 = arith.constant 1 : i32
    %c8_i32_19 = arith.constant 8 : i32
    %45 = arith.muli %c1_i32, %c8_i32_19 : i32
    %46 = arith.index_cast %45 : i32 to index
    %c0_20 = arith.constant 0 : index
    %47 = vector.load %arg10[%46, %c0_20] : memref<64x384xf32, #tpu.memory_space<vmem>>, vector<8x384xf32>
    %c0_21 = arith.constant 0 : index
    %c0_22 = arith.constant 0 : index
    %48 = vector.load %arg3[%c0_21, %c0_22] : memref<128x384xf32, #tpu.memory_space<vmem>>, vector<128x384xf32>
    %cst_23 = arith.constant dense<0.000000e+00> : vector<8x384xf32>
    %49 = tpu.matmul %42, %48, %cst_23 {dimension_numbers = #tpu.dot_dimension_numbers<[1], [0], [0], [1], [0, 0, 1, 1], [], []>} : vector<8x128xf32>, vector<128x384xf32>, vector<8x384xf32> -> vector<8x384xf32>
    %50 = vector.extract_strided_slice %47 {offsets = [0, 0], sizes = [8, 128], strides = [1, 1]} : vector<8x384xf32> to vector<8x128xf32>
    %51 = vector.extract_strided_slice %49 {offsets = [0, 0], sizes = [8, 128], strides = [1, 1]} : vector<8x384xf32> to vector<8x128xf32>
    %52 = arith.addf %50, %51 : vector<8x128xf32>
    %53 = arith.negf %52 : vector<8x128xf32>
    %54 = math.exp %53 : vector<8x128xf32>
    %cst_24 = arith.constant 1.000000e+00 : f32
    %55 = vector.broadcast %cst_24 : f32 to vector<8x128xf32>
    %56 = arith.addf %55, %54 : vector<8x128xf32>
    %57 = arith.divf %55, %56 : vector<8x128xf32>
    %58 = vector.extract_strided_slice %47 {offsets = [0, 128], sizes = [8, 128], strides = [1, 1]} : vector<8x384xf32> to vector<8x128xf32>
    %59 = vector.extract_strided_slice %49 {offsets = [0, 128], sizes = [8, 128], strides = [1, 1]} : vector<8x384xf32> to vector<8x128xf32>
    %60 = arith.addf %58, %59 : vector<8x128xf32>
    %61 = arith.negf %60 : vector<8x128xf32>
    %62 = math.exp %61 : vector<8x128xf32>
    %cst_25 = arith.constant 1.000000e+00 : f32
    %63 = vector.broadcast %cst_25 : f32 to vector<8x128xf32>
    %64 = arith.addf %63, %62 : vector<8x128xf32>
    %65 = arith.divf %63, %64 : vector<8x128xf32>
    %66 = vector.extract_strided_slice %47 {offsets = [0, 256], sizes = [8, 128], strides = [1, 1]} : vector<8x384xf32> to vector<8x128xf32>
    %67 = vector.extract_strided_slice %49 {offsets = [0, 256], sizes = [8, 128], strides = [1, 1]} : vector<8x384xf32> to vector<8x128xf32>
    %68 = arith.addf %67, %9 : vector<8x128xf32>
    %69 = arith.mulf %57, %68 : vector<8x128xf32>
    %70 = arith.addf %66, %69 : vector<8x128xf32>
    %71 = math.tanh %70 : vector<8x128xf32>
    %cst_26 = arith.constant 1.000000e+00 : f32
    %72 = vector.broadcast %cst_26 : f32 to vector<8x128xf32>
    %73 = arith.subf %72, %65 : vector<8x128xf32>
    %74 = arith.mulf %73, %71 : vector<8x128xf32>
    %75 = arith.mulf %65, %42 : vector<8x128xf32>
    %76 = arith.addf %74, %75 : vector<8x128xf32>
    %77 = arith.index_cast %45 : i32 to index
    %c0_27 = arith.constant 0 : index
    %78 = vector.load %arg11[%77, %c0_27] : memref<64x128xf32, #tpu.memory_space<vmem>>, vector<8x128xf32>
    tpu.vector_store %arg11[%77, %c0_27], %76 {strides = array<i32>} : memref<64x128xf32, #tpu.memory_space<vmem>>, vector<8x128xf32>,
    %c2_i32 = arith.constant 2 : i32
    %c8_i32_28 = arith.constant 8 : i32
    %79 = arith.muli %c2_i32, %c8_i32_28 : i32
    %80 = arith.index_cast %79 : i32 to index
    %c0_29 = arith.constant 0 : index
    %81 = vector.load %arg10[%80, %c0_29] : memref<64x384xf32, #tpu.memory_space<vmem>>, vector<8x384xf32>
    %c0_30 = arith.constant 0 : index
    %c0_31 = arith.constant 0 : index
    %82 = vector.load %arg3[%c0_30, %c0_31] : memref<128x384xf32, #tpu.memory_space<vmem>>, vector<128x384xf32>
    %cst_32 = arith.constant dense<0.000000e+00> : vector<8x384xf32>
    %83 = tpu.matmul %76, %82, %cst_32 {dimension_numbers = #tpu.dot_dimension_numbers<[1], [0], [0], [1], [0, 0, 1, 1], [], []>} : vector<8x128xf32>, vector<128x384xf32>, vector<8x384xf32> -> vector<8x384xf32>
    %84 = vector.extract_strided_slice %81 {offsets = [0, 0], sizes = [8, 128], strides = [1, 1]} : vector<8x384xf32> to vector<8x128xf32>
    %85 = vector.extract_strided_slice %83 {offsets = [0, 0], sizes = [8, 128], strides = [1, 1]} : vector<8x384xf32> to vector<8x128xf32>
    %86 = arith.addf %84, %85 : vector<8x128xf32>
    %87 = arith.negf %86 : vector<8x128xf32>
    %88 = math.exp %87 : vector<8x128xf32>
    %cst_33 = arith.constant 1.000000e+00 : f32
    %89 = vector.broadcast %cst_33 : f32 to vector<8x128xf32>
    %90 = arith.addf %89, %88 : vector<8x128xf32>
    %91 = arith.divf %89, %90 : vector<8x128xf32>
    %92 = vector.extract_strided_slice %81 {offsets = [0, 128], sizes = [8, 128], strides = [1, 1]} : vector<8x384xf32> to vector<8x128xf32>
    %93 = vector.extract_strided_slice %83 {offsets = [0, 128], sizes = [8, 128], strides = [1, 1]} : vector<8x384xf32> to vector<8x128xf32>
    %94 = arith.addf %92, %93 : vector<8x128xf32>
    %95 = arith.negf %94 : vector<8x128xf32>
    %96 = math.exp %95 : vector<8x128xf32>
    %cst_34 = arith.constant 1.000000e+00 : f32
    %97 = vector.broadcast %cst_34 : f32 to vector<8x128xf32>
    %98 = arith.addf %97, %96 : vector<8x128xf32>
    %99 = arith.divf %97, %98 : vector<8x128xf32>
    %100 = vector.extract_strided_slice %81 {offsets = [0, 256], sizes = [8, 128], strides = [1, 1]} : vector<8x384xf32> to vector<8x128xf32>
    %101 = vector.extract_strided_slice %83 {offsets = [0, 256], sizes = [8, 128], strides = [1, 1]} : vector<8x384xf32> to vector<8x128xf32>
    %102 = arith.addf %101, %9 : vector<8x128xf32>
    %103 = arith.mulf %91, %102 : vector<8x128xf32>
    %104 = arith.addf %100, %103 : vector<8x128xf32>
    %105 = math.tanh %104 : vector<8x128xf32>
    %cst_35 = arith.constant 1.000000e+00 : f32
    %106 = vector.broadcast %cst_35 : f32 to vector<8x128xf32>
    %107 = arith.subf %106, %99 : vector<8x128xf32>
    %108 = arith.mulf %107, %105 : vector<8x128xf32>
    %109 = arith.mulf %99, %76 : vector<8x128xf32>
    %110 = arith.addf %108, %109 : vector<8x128xf32>
    %111 = arith.index_cast %79 : i32 to index
    %c0_36 = arith.constant 0 : index
    %112 = vector.load %arg11[%111, %c0_36] : memref<64x128xf32, #tpu.memory_space<vmem>>, vector<8x128xf32>
    tpu.vector_store %arg11[%111, %c0_36], %110 {strides = array<i32>} : memref<64x128xf32, #tpu.memory_space<vmem>>, vector<8x128xf32>,
    %c3_i32 = arith.constant 3 : i32
    %c8_i32_37 = arith.constant 8 : i32
    %113 = arith.muli %c3_i32, %c8_i32_37 : i32
    %114 = arith.index_cast %113 : i32 to index
    %c0_38 = arith.constant 0 : index
    %115 = vector.load %arg10[%114, %c0_38] : memref<64x384xf32, #tpu.memory_space<vmem>>, vector<8x384xf32>
    %c0_39 = arith.constant 0 : index
    %c0_40 = arith.constant 0 : index
    %116 = vector.load %arg3[%c0_39, %c0_40] : memref<128x384xf32, #tpu.memory_space<vmem>>, vector<128x384xf32>
    %cst_41 = arith.constant dense<0.000000e+00> : vector<8x384xf32>
    %117 = tpu.matmul %110, %116, %cst_41 {dimension_numbers = #tpu.dot_dimension_numbers<[1], [0], [0], [1], [0, 0, 1, 1], [], []>} : vector<8x128xf32>, vector<128x384xf32>, vector<8x384xf32> -> vector<8x384xf32>
    %118 = vector.extract_strided_slice %115 {offsets = [0, 0], sizes = [8, 128], strides = [1, 1]} : vector<8x384xf32> to vector<8x128xf32>
    %119 = vector.extract_strided_slice %117 {offsets = [0, 0], sizes = [8, 128], strides = [1, 1]} : vector<8x384xf32> to vector<8x128xf32>
    %120 = arith.addf %118, %119 : vector<8x128xf32>
    %121 = arith.negf %120 : vector<8x128xf32>
    %122 = math.exp %121 : vector<8x128xf32>
    %cst_42 = arith.constant 1.000000e+00 : f32
    %123 = vector.broadcast %cst_42 : f32 to vector<8x128xf32>
    %124 = arith.addf %123, %122 : vector<8x128xf32>
    %125 = arith.divf %123, %124 : vector<8x128xf32>
    %126 = vector.extract_strided_slice %115 {offsets = [0, 128], sizes = [8, 128], strides = [1, 1]} : vector<8x384xf32> to vector<8x128xf32>
    %127 = vector.extract_strided_slice %117 {offsets = [0, 128], sizes = [8, 128], strides = [1, 1]} : vector<8x384xf32> to vector<8x128xf32>
    %128 = arith.addf %126, %127 : vector<8x128xf32>
    %129 = arith.negf %128 : vector<8x128xf32>
    %130 = math.exp %129 : vector<8x128xf32>
    %cst_43 = arith.constant 1.000000e+00 : f32
    %131 = vector.broadcast %cst_43 : f32 to vector<8x128xf32>
    %132 = arith.addf %131, %130 : vector<8x128xf32>
    %133 = arith.divf %131, %132 : vector<8x128xf32>
    %134 = vector.extract_strided_slice %115 {offsets = [0, 256], sizes = [8, 128], strides = [1, 1]} : vector<8x384xf32> to vector<8x128xf32>
    %135 = vector.extract_strided_slice %117 {offsets = [0, 256], sizes = [8, 128], strides = [1, 1]} : vector<8x384xf32> to vector<8x128xf32>
    %136 = arith.addf %135, %9 : vector<8x128xf32>
    %137 = arith.mulf %125, %136 : vector<8x128xf32>
    %138 = arith.addf %134, %137 : vector<8x128xf32>
    %139 = math.tanh %138 : vector<8x128xf32>
    %cst_44 = arith.constant 1.000000e+00 : f32
    %140 = vector.broadcast %cst_44 : f32 to vector<8x128xf32>
    %141 = arith.subf %140, %133 : vector<8x128xf32>
    %142 = arith.mulf %141, %139 : vector<8x128xf32>
    %143 = arith.mulf %133, %110 : vector<8x128xf32>
    %144 = arith.addf %142, %143 : vector<8x128xf32>
    %145 = arith.index_cast %113 : i32 to index
    %c0_45 = arith.constant 0 : index
    %146 = vector.load %arg11[%145, %c0_45] : memref<64x128xf32, #tpu.memory_space<vmem>>, vector<8x128xf32>
    tpu.vector_store %arg11[%145, %c0_45], %144 {strides = array<i32>} : memref<64x128xf32, #tpu.memory_space<vmem>>, vector<8x128xf32>,
    %c4_i32 = arith.constant 4 : i32
    %c8_i32_46 = arith.constant 8 : i32
    %147 = arith.muli %c4_i32, %c8_i32_46 : i32
    %148 = arith.index_cast %147 : i32 to index
    %c0_47 = arith.constant 0 : index
    %149 = vector.load %arg10[%148, %c0_47] : memref<64x384xf32, #tpu.memory_space<vmem>>, vector<8x384xf32>
    %c0_48 = arith.constant 0 : index
    %c0_49 = arith.constant 0 : index
    %150 = vector.load %arg3[%c0_48, %c0_49] : memref<128x384xf32, #tpu.memory_space<vmem>>, vector<128x384xf32>
    %cst_50 = arith.constant dense<0.000000e+00> : vector<8x384xf32>
    %151 = tpu.matmul %144, %150, %cst_50 {dimension_numbers = #tpu.dot_dimension_numbers<[1], [0], [0], [1], [0, 0, 1, 1], [], []>} : vector<8x128xf32>, vector<128x384xf32>, vector<8x384xf32> -> vector<8x384xf32>
    %152 = vector.extract_strided_slice %149 {offsets = [0, 0], sizes = [8, 128], strides = [1, 1]} : vector<8x384xf32> to vector<8x128xf32>
    %153 = vector.extract_strided_slice %151 {offsets = [0, 0], sizes = [8, 128], strides = [1, 1]} : vector<8x384xf32> to vector<8x128xf32>
    %154 = arith.addf %152, %153 : vector<8x128xf32>
    %155 = arith.negf %154 : vector<8x128xf32>
    %156 = math.exp %155 : vector<8x128xf32>
    %cst_51 = arith.constant 1.000000e+00 : f32
    %157 = vector.broadcast %cst_51 : f32 to vector<8x128xf32>
    %158 = arith.addf %157, %156 : vector<8x128xf32>
    %159 = arith.divf %157, %158 : vector<8x128xf32>
    %160 = vector.extract_strided_slice %149 {offsets = [0, 128], sizes = [8, 128], strides = [1, 1]} : vector<8x384xf32> to vector<8x128xf32>
    %161 = vector.extract_strided_slice %151 {offsets = [0, 128], sizes = [8, 128], strides = [1, 1]} : vector<8x384xf32> to vector<8x128xf32>
    %162 = arith.addf %160, %161 : vector<8x128xf32>
    %163 = arith.negf %162 : vector<8x128xf32>
    %164 = math.exp %163 : vector<8x128xf32>
    %cst_52 = arith.constant 1.000000e+00 : f32
    %165 = vector.broadcast %cst_52 : f32 to vector<8x128xf32>
    %166 = arith.addf %165, %164 : vector<8x128xf32>
    %167 = arith.divf %165, %166 : vector<8x128xf32>
    %168 = vector.extract_strided_slice %149 {offsets = [0, 256], sizes = [8, 128], strides = [1, 1]} : vector<8x384xf32> to vector<8x128xf32>
    %169 = vector.extract_strided_slice %151 {offsets = [0, 256], sizes = [8, 128], strides = [1, 1]} : vector<8x384xf32> to vector<8x128xf32>
    %170 = arith.addf %169, %9 : vector<8x128xf32>
    %171 = arith.mulf %159, %170 : vector<8x128xf32>
    %172 = arith.addf %168, %171 : vector<8x128xf32>
    %173 = math.tanh %172 : vector<8x128xf32>
    %cst_53 = arith.constant 1.000000e+00 : f32
    %174 = vector.broadcast %cst_53 : f32 to vector<8x128xf32>
    %175 = arith.subf %174, %167 : vector<8x128xf32>
    %176 = arith.mulf %175, %173 : vector<8x128xf32>
    %177 = arith.mulf %167, %144 : vector<8x128xf32>
    %178 = arith.addf %176, %177 : vector<8x128xf32>
    %179 = arith.index_cast %147 : i32 to index
    %c0_54 = arith.constant 0 : index
    %180 = vector.load %arg11[%179, %c0_54] : memref<64x128xf32, #tpu.memory_space<vmem>>, vector<8x128xf32>
    tpu.vector_store %arg11[%179, %c0_54], %178 {strides = array<i32>} : memref<64x128xf32, #tpu.memory_space<vmem>>, vector<8x128xf32>,
    %c5_i32 = arith.constant 5 : i32
    %c8_i32_55 = arith.constant 8 : i32
    %181 = arith.muli %c5_i32, %c8_i32_55 : i32
    %182 = arith.index_cast %181 : i32 to index
    %c0_56 = arith.constant 0 : index
    %183 = vector.load %arg10[%182, %c0_56] : memref<64x384xf32, #tpu.memory_space<vmem>>, vector<8x384xf32>
    %c0_57 = arith.constant 0 : index
    %c0_58 = arith.constant 0 : index
    %184 = vector.load %arg3[%c0_57, %c0_58] : memref<128x384xf32, #tpu.memory_space<vmem>>, vector<128x384xf32>
    %cst_59 = arith.constant dense<0.000000e+00> : vector<8x384xf32>
    %185 = tpu.matmul %178, %184, %cst_59 {dimension_numbers = #tpu.dot_dimension_numbers<[1], [0], [0], [1], [0, 0, 1, 1], [], []>} : vector<8x128xf32>, vector<128x384xf32>, vector<8x384xf32> -> vector<8x384xf32>
    %186 = vector.extract_strided_slice %183 {offsets = [0, 0], sizes = [8, 128], strides = [1, 1]} : vector<8x384xf32> to vector<8x128xf32>
    %187 = vector.extract_strided_slice %185 {offsets = [0, 0], sizes = [8, 128], strides = [1, 1]} : vector<8x384xf32> to vector<8x128xf32>
    %188 = arith.addf %186, %187 : vector<8x128xf32>
    %189 = arith.negf %188 : vector<8x128xf32>
    %190 = math.exp %189 : vector<8x128xf32>
    %cst_60 = arith.constant 1.000000e+00 : f32
    %191 = vector.broadcast %cst_60 : f32 to vector<8x128xf32>
    %192 = arith.addf %191, %190 : vector<8x128xf32>
    %193 = arith.divf %191, %192 : vector<8x128xf32>
    %194 = vector.extract_strided_slice %183 {offsets = [0, 128], sizes = [8, 128], strides = [1, 1]} : vector<8x384xf32> to vector<8x128xf32>
    %195 = vector.extract_strided_slice %185 {offsets = [0, 128], sizes = [8, 128], strides = [1, 1]} : vector<8x384xf32> to vector<8x128xf32>
    %196 = arith.addf %194, %195 : vector<8x128xf32>
    %197 = arith.negf %196 : vector<8x128xf32>
    %198 = math.exp %197 : vector<8x128xf32>
    %cst_61 = arith.constant 1.000000e+00 : f32
    %199 = vector.broadcast %cst_61 : f32 to vector<8x128xf32>
    %200 = arith.addf %199, %198 : vector<8x128xf32>
    %201 = arith.divf %199, %200 : vector<8x128xf32>
    %202 = vector.extract_strided_slice %183 {offsets = [0, 256], sizes = [8, 128], strides = [1, 1]} : vector<8x384xf32> to vector<8x128xf32>
    %203 = vector.extract_strided_slice %185 {offsets = [0, 256], sizes = [8, 128], strides = [1, 1]} : vector<8x384xf32> to vector<8x128xf32>
    %204 = arith.addf %203, %9 : vector<8x128xf32>
    %205 = arith.mulf %193, %204 : vector<8x128xf32>
    %206 = arith.addf %202, %205 : vector<8x128xf32>
    %207 = math.tanh %206 : vector<8x128xf32>
    %cst_62 = arith.constant 1.000000e+00 : f32
    %208 = vector.broadcast %cst_62 : f32 to vector<8x128xf32>
    %209 = arith.subf %208, %201 : vector<8x128xf32>
    %210 = arith.mulf %209, %207 : vector<8x128xf32>
    %211 = arith.mulf %201, %178 : vector<8x128xf32>
    %212 = arith.addf %210, %211 : vector<8x128xf32>
    %213 = arith.index_cast %181 : i32 to index
    %c0_63 = arith.constant 0 : index
    %214 = vector.load %arg11[%213, %c0_63] : memref<64x128xf32, #tpu.memory_space<vmem>>, vector<8x128xf32>
    tpu.vector_store %arg11[%213, %c0_63], %212 {strides = array<i32>} : memref<64x128xf32, #tpu.memory_space<vmem>>, vector<8x128xf32>,
    %c6_i32 = arith.constant 6 : i32
    %c8_i32_64 = arith.constant 8 : i32
    %215 = arith.muli %c6_i32, %c8_i32_64 : i32
    %216 = arith.index_cast %215 : i32 to index
    %c0_65 = arith.constant 0 : index
    %217 = vector.load %arg10[%216, %c0_65] : memref<64x384xf32, #tpu.memory_space<vmem>>, vector<8x384xf32>
    %c0_66 = arith.constant 0 : index
    %c0_67 = arith.constant 0 : index
    %218 = vector.load %arg3[%c0_66, %c0_67] : memref<128x384xf32, #tpu.memory_space<vmem>>, vector<128x384xf32>
    %cst_68 = arith.constant dense<0.000000e+00> : vector<8x384xf32>
    %219 = tpu.matmul %212, %218, %cst_68 {dimension_numbers = #tpu.dot_dimension_numbers<[1], [0], [0], [1], [0, 0, 1, 1], [], []>} : vector<8x128xf32>, vector<128x384xf32>, vector<8x384xf32> -> vector<8x384xf32>
    %220 = vector.extract_strided_slice %217 {offsets = [0, 0], sizes = [8, 128], strides = [1, 1]} : vector<8x384xf32> to vector<8x128xf32>
    %221 = vector.extract_strided_slice %219 {offsets = [0, 0], sizes = [8, 128], strides = [1, 1]} : vector<8x384xf32> to vector<8x128xf32>
    %222 = arith.addf %220, %221 : vector<8x128xf32>
    %223 = arith.negf %222 : vector<8x128xf32>
    %224 = math.exp %223 : vector<8x128xf32>
    %cst_69 = arith.constant 1.000000e+00 : f32
    %225 = vector.broadcast %cst_69 : f32 to vector<8x128xf32>
    %226 = arith.addf %225, %224 : vector<8x128xf32>
    %227 = arith.divf %225, %226 : vector<8x128xf32>
    %228 = vector.extract_strided_slice %217 {offsets = [0, 128], sizes = [8, 128], strides = [1, 1]} : vector<8x384xf32> to vector<8x128xf32>
    %229 = vector.extract_strided_slice %219 {offsets = [0, 128], sizes = [8, 128], strides = [1, 1]} : vector<8x384xf32> to vector<8x128xf32>
    %230 = arith.addf %228, %229 : vector<8x128xf32>
    %231 = arith.negf %230 : vector<8x128xf32>
    %232 = math.exp %231 : vector<8x128xf32>
    %cst_70 = arith.constant 1.000000e+00 : f32
    %233 = vector.broadcast %cst_70 : f32 to vector<8x128xf32>
    %234 = arith.addf %233, %232 : vector<8x128xf32>
    %235 = arith.divf %233, %234 : vector<8x128xf32>
    %236 = vector.extract_strided_slice %217 {offsets = [0, 256], sizes = [8, 128], strides = [1, 1]} : vector<8x384xf32> to vector<8x128xf32>
    %237 = vector.extract_strided_slice %219 {offsets = [0, 256], sizes = [8, 128], strides = [1, 1]} : vector<8x384xf32> to vector<8x128xf32>
    %238 = arith.addf %237, %9 : vector<8x128xf32>
    %239 = arith.mulf %227, %238 : vector<8x128xf32>
    %240 = arith.addf %236, %239 : vector<8x128xf32>
    %241 = math.tanh %240 : vector<8x128xf32>
    %cst_71 = arith.constant 1.000000e+00 : f32
    %242 = vector.broadcast %cst_71 : f32 to vector<8x128xf32>
    %243 = arith.subf %242, %235 : vector<8x128xf32>
    %244 = arith.mulf %243, %241 : vector<8x128xf32>
    %245 = arith.mulf %235, %212 : vector<8x128xf32>
    %246 = arith.addf %244, %245 : vector<8x128xf32>
    %247 = arith.index_cast %215 : i32 to index
    %c0_72 = arith.constant 0 : index
    %248 = vector.load %arg11[%247, %c0_72] : memref<64x128xf32, #tpu.memory_space<vmem>>, vector<8x128xf32>
    tpu.vector_store %arg11[%247, %c0_72], %246 {strides = array<i32>} : memref<64x128xf32, #tpu.memory_space<vmem>>, vector<8x128xf32>,
    %c7_i32 = arith.constant 7 : i32
    %c8_i32_73 = arith.constant 8 : i32
    %249 = arith.muli %c7_i32, %c8_i32_73 : i32
    %250 = arith.index_cast %249 : i32 to index
    %c0_74 = arith.constant 0 : index
    %251 = vector.load %arg10[%250, %c0_74] : memref<64x384xf32, #tpu.memory_space<vmem>>, vector<8x384xf32>
    %c0_75 = arith.constant 0 : index
    %c0_76 = arith.constant 0 : index
    %252 = vector.load %arg3[%c0_75, %c0_76] : memref<128x384xf32, #tpu.memory_space<vmem>>, vector<128x384xf32>
    %cst_77 = arith.constant dense<0.000000e+00> : vector<8x384xf32>
    %253 = tpu.matmul %246, %252, %cst_77 {dimension_numbers = #tpu.dot_dimension_numbers<[1], [0], [0], [1], [0, 0, 1, 1], [], []>} : vector<8x128xf32>, vector<128x384xf32>, vector<8x384xf32> -> vector<8x384xf32>
    %254 = vector.extract_strided_slice %251 {offsets = [0, 0], sizes = [8, 128], strides = [1, 1]} : vector<8x384xf32> to vector<8x128xf32>
    %255 = vector.extract_strided_slice %253 {offsets = [0, 0], sizes = [8, 128], strides = [1, 1]} : vector<8x384xf32> to vector<8x128xf32>
    %256 = arith.addf %254, %255 : vector<8x128xf32>
    %257 = arith.negf %256 : vector<8x128xf32>
    %258 = math.exp %257 : vector<8x128xf32>
    %cst_78 = arith.constant 1.000000e+00 : f32
    %259 = vector.broadcast %cst_78 : f32 to vector<8x128xf32>
    %260 = arith.addf %259, %258 : vector<8x128xf32>
    %261 = arith.divf %259, %260 : vector<8x128xf32>
    %262 = vector.extract_strided_slice %251 {offsets = [0, 128], sizes = [8, 128], strides = [1, 1]} : vector<8x384xf32> to vector<8x128xf32>
    %263 = vector.extract_strided_slice %253 {offsets = [0, 128], sizes = [8, 128], strides = [1, 1]} : vector<8x384xf32> to vector<8x128xf32>
    %264 = arith.addf %262, %263 : vector<8x128xf32>
    %265 = arith.negf %264 : vector<8x128xf32>
    %266 = math.exp %265 : vector<8x128xf32>
    %cst_79 = arith.constant 1.000000e+00 : f32
    %267 = vector.broadcast %cst_79 : f32 to vector<8x128xf32>
    %268 = arith.addf %267, %266 : vector<8x128xf32>
    %269 = arith.divf %267, %268 : vector<8x128xf32>
    %270 = vector.extract_strided_slice %251 {offsets = [0, 256], sizes = [8, 128], strides = [1, 1]} : vector<8x384xf32> to vector<8x128xf32>
    %271 = vector.extract_strided_slice %253 {offsets = [0, 256], sizes = [8, 128], strides = [1, 1]} : vector<8x384xf32> to vector<8x128xf32>
    %272 = arith.addf %271, %9 : vector<8x128xf32>
    %273 = arith.mulf %261, %272 : vector<8x128xf32>
    %274 = arith.addf %270, %273 : vector<8x128xf32>
    %275 = math.tanh %274 : vector<8x128xf32>
    %cst_80 = arith.constant 1.000000e+00 : f32
    %276 = vector.broadcast %cst_80 : f32 to vector<8x128xf32>
    %277 = arith.subf %276, %269 : vector<8x128xf32>
    %278 = arith.mulf %277, %275 : vector<8x128xf32>
    %279 = arith.mulf %269, %246 : vector<8x128xf32>
    %280 = arith.addf %278, %279 : vector<8x128xf32>
    %281 = arith.index_cast %249 : i32 to index
    %c0_81 = arith.constant 0 : index
    %282 = vector.load %arg11[%281, %c0_81] : memref<64x128xf32, #tpu.memory_space<vmem>>, vector<8x128xf32>
    tpu.vector_store %arg11[%281, %c0_81], %280 {strides = array<i32>} : memref<64x128xf32, #tpu.memory_space<vmem>>, vector<8x128xf32>,
    %c8_i32_82 = arith.constant 8 : i32
    %c0_83 = arith.constant 0 : index
    %c0_84 = arith.constant 0 : index
    %283 = vector.load %arg9[%c0_83, %c0_84] : memref<8x128xf32, #tpu.memory_space<vmem>>, vector<8x128xf32>
    tpu.vector_store %arg9[%c0_83, %c0_84], %280 {strides = array<i32>} : memref<8x128xf32, #tpu.memory_space<vmem>>, vector<8x128xf32>,
    %c0_85 = arith.constant 0 : index
    %c0_86 = arith.constant 0 : index
    %284 = vector.load %arg11[%c0_85, %c0_86] : memref<64x128xf32, #tpu.memory_space<vmem>>, vector<64x128xf32>
    %c0_87 = arith.constant 0 : index
    %c0_88 = arith.constant 0 : index
    %285 = vector.load %arg6[%c0_87, %c0_88] : memref<128x128xf32, #tpu.memory_space<vmem>>, vector<128x128xf32>
    %cst_89 = arith.constant dense<0.000000e+00> : vector<64x128xf32>
    %286 = tpu.matmul %284, %285, %cst_89 {dimension_numbers = #tpu.dot_dimension_numbers<[1], [0], [0], [1], [0, 0, 1, 1], [], []>} : vector<64x128xf32>, vector<128x128xf32>, vector<64x128xf32> -> vector<64x128xf32>
    %c0_90 = arith.constant 0 : index
    %c0_91 = arith.constant 0 : index
    %287 = vector.load %arg7[%c0_90, %c0_91] : memref<1x128xf32, #tpu.memory_space<vmem>>, vector<1x128xf32>
    %288 = vector.broadcast %287 : vector<1x128xf32> to vector<64x128xf32>
    %289 = arith.addf %286, %288 : vector<64x128xf32>
    %c0_92 = arith.constant 0 : index
    %c0_93 = arith.constant 0 : index
    %290 = vector.load %arg8[%c0_92, %c0_93] : memref<64x128xf32, #tpu.memory_space<vmem>>, vector<64x128xf32>
    tpu.vector_store %arg8[%c0_92, %c0_93], %289 {strides = array<i32>} : memref<64x128xf32, #tpu.memory_space<vmem>>, vector<64x128xf32>,
    return
  }
}

</mosaic_0001>

<bundles_post_ra>
// kernel: encoder_rnn_numerical_forward.1
= control target key start
LH: loop header
LB: loop body
LE: loop exit
PB: predicated region body
PF: predicated region fallthrough
CT: control target
= control target key end

     0   :  { %s3180_s2 = inlined_call_operand.vmem [shape: f32[128,384], index: 2, kind: input, shape index: {}]   ;;  %s3181_s0 = inlined_call_operand.vmem [shape: f32[64,128], index: 0, kind: input, shape index: {}]   ;;  %s3182_s3 = inlined_call_operand.vmem [shape: f32[128,384], index: 3, kind: input, shape index: {}]   ;;  %s3183_s1 = inlined_call_operand.vmem [shape: f32[8,128], index: 1, kind: input, shape index: {}]   ;;  %s3184_s5 = inlined_call_operand.vmem [shape: f32[1,128], index: 5, kind: input, shape index: {}]   ;;  %s3185_s4 = inlined_call_operand.vmem [shape: f32[1,384], index: 4, kind: input, shape index: {}]   ;;  %s3186_s6 = inlined_call_operand.vmem [shape: f32[128,128], index: 6, kind: input, shape index: {}]   ;;  %s3187_s7 = inlined_call_operand.vmem [shape: f32[1,128], index: 7, kind: input, shape index: {}]   ;;  %s3188_s8 = inlined_call_operand.vmem [shape: f32[64,128], index: 8, kind: output, shape index: {0}]   ;;  %s3189_s9 = inlined_call_operand.vmem [shape: f32[8,128], index: 9, kind: output, shape index: {1}]  }
   0x1   :  { %v86_v0 = vld [vmem:[%s3180_s2 + $0x178] sm:$0xff]  ;;  %v84_v1 = vld [vmem:[%s3180_s2 + $0x168] sm:$0xff]  ;;  %v83_v2 = vld [vmem:[%s3180_s2 + $0x160] sm:$0xff] }
   0x2   :  { %1629 = vmatpush.msra.mxu3 %v86_v0  ;;  %95 = vmatpush.msra.mxu0 %v84_v1  ;;  %v81_v3 = vld [vmem:[%s3180_s2 + $0x150] sm:$0xff]  ;;  %v80_v4 = vld [vmem:[%s3180_s2 + $0x148] sm:$0xff]  ;;  %v78_v5 = vld [vmem:[%s3180_s2 + $0x138] sm:$0xff] }
   0x3   :  { %177 = vmatpush.msra.mxu2 %v86_v0  ;;  %v77_v6 = vld [vmem:[%s3180_s2 + $0x130] sm:$0xff]  ;;  %v75_v7 = vld [vmem:[%s3180_s2 + $0x120] sm:$0xff]  ;;  %v74_v8 = vld [vmem:[%s3180_s2 + $0x118] sm:$0xff] }
   0x4   :  { %1630 = vmatpush.msra.mxu3 %v83_v2  ;;  %96 = vmatpush.msra.mxu0 %v81_v3  ;;  %v72_v9 = vld [vmem:[%s3180_s2 + $0x108] sm:$0xff]  ;;  %v71_v10 = vld [vmem:[%s3180_s2 + $0x100] sm:$0xff]  ;;  %v69_v11 = vld [vmem:[%s3180_s2 + $0xf0] sm:$0xff] }
   0x5   :  { %178 = vmatpush.msra.mxu2 %v83_v2  ;;  %v68_v12 = vld [vmem:[%s3180_s2 + $0xe8] sm:$0xff]  ;;  %v66_v13 = vld [vmem:[%s3180_s2 + $0xd8] sm:$0xff]  ;;  %v65_v14 = vld [vmem:[%s3180_s2 + $0xd0] sm:$0xff] }
   0x6   :  { %1631 = vmatpush.msra.mxu3 %v80_v4  ;;  %97 = vmatpush.msra.mxu0 %v78_v5  ;;  %v63_v15 = vld [vmem:[%s3180_s2 + $0xc0] sm:$0xff]  ;;  %v62_v16 = vld [vmem:[%s3180_s2 + $0xb8] sm:$0xff]  ;;  %v60_v17 = vld [vmem:[%s3180_s2 + $0xa8] sm:$0xff] }
   0x7   :  { %179 = vmatpush.msra.mxu2 %v80_v4  ;;  %v59_v18 = vld [vmem:[%s3180_s2 + $0xa0] sm:$0xff]  ;;  %v57_v19 = vld [vmem:[%s3180_s2 + $0x90] sm:$0xff]  ;;  %v56_v20 = vld [vmem:[%s3180_s2 + $0x88] sm:$0xff] }
   0x8   :  { %1632 = vmatpush.msra.mxu3 %v77_v6  ;;  %98 = vmatpush.msra.mxu0 %v75_v7  ;;  %v54_v21 = vld [vmem:[%s3180_s2 + $0x78] sm:$0xff]  ;;  %v53_v22 = vld [vmem:[%s3180_s2 + $0x70] sm:$0xff]  ;;  %v51_v23 = vld [vmem:[%s3180_s2 + $0x60] sm:$0xff] }
   0x9   :  { %180 = vmatpush.msra.mxu2 %v77_v6  ;;  %v50_v24 = vld [vmem:[%s3180_s2 + $0x58] sm:$0xff]  ;;  %v48_v25 = vld [vmem:[%s3180_s2 + $0x48] sm:$0xff]  ;;  %v47_v26 = vld [vmem:[%s3180_s2 + $0x40] sm:$0xff] }
   0xa   :  { %1633 = vmatpush.msra.mxu3 %v74_v8  ;;  %99 = vmatpush.msra.mxu0 %v72_v9  ;;  %v45_v27 = vld [vmem:[%s3180_s2 + $0x30] sm:$0xff]  ;;  %v44_v28 = vld [vmem:[%s3180_s2 + $0x28] sm:$0xff]  ;;  %v42_v29 = vld [vmem:[%s3180_s2 + $0x18] sm:$0xff] }
   0xb   :  { %181 = vmatpush.msra.mxu2 %v74_v8  ;;  %v41_v30 = vld [vmem:[%s3180_s2 + $0x10] sm:$0xff]  ;;  %v39_v31 = vld [vmem:[%s3180_s2] sm:$0xff]  ;;  %v1887_v34 = vld [vmem:[%s3182_s3 + $0x168] sm:$0xff] }
   0xc   :  { %1634 = vmatpush.msra.mxu3 %v71_v10  ;;  %100 = vmatpush.msra.mxu0 %v69_v11  ;;  %v1877_v32 = vld [vmem:[%s3181_s0 + $0x20] sm:$0xff]  ;;  %v1892_v35 = vld [vmem:[%s3182_s3 + $0x178] sm:$0xff]  ;;  %v1899_v36 = vld [vmem:[%s3182_s3 + $0x150] sm:$0xff] }
   0xd   :  { %182 = vmatpush.msra.mxu2 %v71_v10  ;;  %v1882_v33 = vld [vmem:[%s3181_s0] sm:$0xff]  ;;  %v1911_v38 = vld [vmem:[%s3182_s3 + $0x138] sm:$0xff]  ;;  %v1916_v39 = vld [vmem:[%s3182_s3 + $0x148] sm:$0xff] }
   0xe   :  { %1635 = vmatpush.msra.mxu3 %v68_v12  ;;  %101 = vmatpush.msra.mxu0 %v66_v13  ;;  %v1904_v37 = vld [vmem:[%s3182_s3 + $0x160] sm:$0xff]  ;;  %v85_v40 = vld [vmem:[%s3180_s2 + $0x170] sm:$0xff]  ;;  %v82_v43 = vld [vmem:[%s3180_s2 + $0x158] sm:$0xff] }
   0xf   :  { %183 = vmatpush.msra.mxu2 %v68_v12  ;;  %v1926_v41 = vld [vmem:[%s3182_s3 + $0x120] sm:$0xff]  ;;  %136 = vmatpush.msra.mxu1 %v85_v40  ;;  %v1931_v42 = vld [vmem:[%s3182_s3 + $0x130] sm:$0xff]  ;;  %v1941_v44 = vld [vmem:[%s3181_s0 + $0x28] sm:$0xff] }
  0x10   :  { %1636 = vmatpush.msra.mxu3 %v65_v14  ;;  %102 = vmatpush.msra.mxu0 %v63_v15  ;;  %v1946_v45 = vld [vmem:[%s3181_s0 + $0x8] sm:$0xff]  ;;  %v1951_v46 = vld [vmem:[%s3182_s3 + $0x170] sm:$0xff]  ;;  %v79_v48 = vld [vmem:[%s3180_s2 + $0x140] sm:$0xff] }
  0x11   :  { %184 = vmatpush.msra.mxu2 %v65_v14  ;;  %v1957_v47 = vld [vmem:[%s3182_s3 + $0x108] sm:$0xff]  ;;  %137 = vmatpush.msra.mxu1 %v82_v43  ;;  %v1970_v49 = vld [vmem:[%s3182_s3 + $0xf0] sm:$0xff]  ;;  %v1975_v50 = vld [vmem:[%s3182_s3 + $0x118] sm:$0xff] }
  0x12   :  { %1637 = vmatpush.msra.mxu3 %v62_v16  ;;  %103 = vmatpush.msra.mxu0 %v60_v17  ;;  %v76_v51 = vld [vmem:[%s3180_s2 + $0x128] sm:$0xff]  ;;  %v1984_v52 = vld [vmem:[%s3182_s3 + $0x158] sm:$0xff]  ;;  %v73_v54 = vld [vmem:[%s3180_s2 + $0x110] sm:$0xff] }
  0x13   :  { %185 = vmatpush.msra.mxu2 %v62_v16  ;;  %138 = vmatpush.msra.mxu1 %v79_v48  ;;  %v1989_v53 = vld [vmem:[%s3182_s3 + $0xd8] sm:$0xff]  ;;  %v2000_v55 = vld [vmem:[%s3182_s3 + $0x140] sm:$0xff]  ;;  %v2020_v59 = vld [vmem:[%s3181_s0 + $0x30] sm:$0xff] }
  0x14   :  { %1638 = vmatpush.msra.mxu3 %v59_v18  ;;  %104 = vmatpush.msra.mxu0 %v57_v19  ;;  %v2005_v56 = vld [vmem:[%s3182_s3 + $0xc0] sm:$0xff]  ;;  %v70_v58 = vld [vmem:[%s3180_s2 + $0xf8] sm:$0xff]  ;;  %v2025_v60 = vld [vmem:[%s3181_s0 + $0x10] sm:$0xff] }
  0x15   :  { %186 = vmatpush.msra.mxu2 %v59_v18  ;;  %139 = vmatpush.msra.mxu1 %v76_v51  ;;  %v2010_v57 = vld [vmem:[%s3182_s3 + $0x100] sm:$0xff]  ;;  %v2030_v61 = vld [vmem:[%s3182_s3 + $0x128] sm:$0xff]  ;;  %v2053_v1 = vld [vmem:[%s3182_s3 + $0x90] sm:$0xff] }
  0x16   :  { %1639 = vmatpush.msra.mxu3 %v56_v20  ;;  %105 = vmatpush.msra.mxu0 %v54_v21  ;;  %v2035_v62 = vld [vmem:[%s3182_s3 + $0xa8] sm:$0xff]  ;;  %v67_v63 = vld [vmem:[%s3180_s2 + $0xe0] sm:$0xff]  ;;  %v2062_v3 = vld [vmem:[%s3182_s3 + $0xd0] sm:$0xff] }
  0x17   :  { %187 = vmatpush.msra.mxu2 %v56_v20  ;;  %140 = vmatpush.msra.mxu1 %v73_v54  ;;  %v2046_v0 = vld [vmem:[%s3182_s3 + $0xe8] sm:$0xff]  ;;  %v2067_v4 = vld [vmem:[%s3182_s3 + $0x78] sm:$0xff]  ;;  %v61_v5 = vld [vmem:[%s3180_s2 + $0xb0] sm:$0xff] }
  0x18   :  { %1640 = vmatpush.msra.mxu3 %v53_v22  ;;  %106 = vmatpush.msra.mxu0 %v51_v23  ;;  %v64_v2 = vld [vmem:[%s3180_s2 + $0xc8] sm:$0xff]  ;;  %v2078_v6 = vld [vmem:[%s3182_s3 + $0x110] sm:$0xff]  ;;  %v2083_v7 = vld [vmem:[%s3182_s3 + $0xb8] sm:$0xff] }
  0x19   :  { %188 = vmatpush.msra.mxu2 %v53_v22  ;;  %141 = vmatpush.msra.mxu1 %v70_v58  ;;  %v2088_v8 = vld [vmem:[%s3182_s3 + $0x60] sm:$0xff]  ;;  %v58_v9 = vld [vmem:[%s3180_s2 + $0x98] sm:$0xff]  ;;  %v2114_v13 = vld [vmem:[%s3182_s3 + $0x48] sm:$0xff] }
  0x1a   :  { %1641 = vmatpush.msra.mxu3 %v50_v24  ;;  %107 = vmatpush.msra.mxu0 %v48_v25  ;;  %v2099_v10 = vld [vmem:[%s3181_s0 + $0x38] sm:$0xff]  ;;  %v2120_v14 = vld [vmem:[%s3182_s3 + $0xa0] sm:$0xff]  ;;  %v2132_v16 = vld [vmem:[%s3182_s3 + $0x30] sm:$0xff] }
  0x1b   :  { %189 = vmatpush.msra.mxu2 %v50_v24  ;;  %142 = vmatpush.msra.mxu1 %v67_v63  ;;  %v2104_v11 = vld [vmem:[%s3181_s0 + $0x18] sm:$0xff]  ;;  %v55_v15 = vld [vmem:[%s3180_s2 + $0x80] sm:$0xff]  ;;  %v2137_v17 = vld [vmem:[%s3182_s3 + $0x88] sm:$0xff] }
  0x1c   :  { %1642 = vmatpush.msra.mxu3 %v47_v26  ;;  %108 = vmatpush.msra.mxu0 %v45_v27  ;;  %v2109_v12 = vld [vmem:[%s3182_s3 + $0xf8] sm:$0xff]  ;;  %v2143_v18 = vld [vmem:[%s3182_s3 + $0xe0] sm:$0xff]  ;;  %v52_v19 = vld [vmem:[%s3180_s2 + $0x68] sm:$0xff] }
  0x1d   :  { %190 = vmatpush.msra.mxu2 %v47_v26  ;;  %143 = vmatpush.msra.mxu1 %v64_v2  ;;  %v2152_v20 = vld [vmem:[%s3182_s3 + $0x18] sm:$0xff]  ;;  %v2157_v21 = vld [vmem:[%s3182_s3 + $0x70] sm:$0xff]  ;;  %v2164_v22 = vld [vmem:[%s3182_s3 + $0xc8] sm:$0xff] }
  0x1e   :  { %1643 = vmatpush.msra.mxu3 %v44_v28  ;;  %109 = vmatpush.msra.mxu0 %v42_v29  ;;  %v49_v23 = vld [vmem:[%s3180_s2 + $0x50] sm:$0xff]  ;;  %v2173_v24 = vld [vmem:[%s3182_s3] sm:$0xff]  ;;  %v2178_v25 = vld [vmem:[%s3182_s3 + $0x58] sm:$0xff] }
  0x1f   :  { %191 = vmatpush.msra.mxu2 %v44_v28  ;;  %144 = vmatpush.msra.mxu1 %v61_v5  ;;  %v2186_v26 = vld [vmem:[%s3183_s1] sm:$0xff]  ;;  %v46_v27 = vld [vmem:[%s3180_s2 + $0x38] sm:$0xff]  ;;  %v40_v40 = vld [vmem:[%s3180_s2 + $0x8] sm:$0xff] }
  0x20   :  { %1644 = vmatpush.msra.mxu3 %v41_v30  ;;  %110 = vmatpush.msra.mxu0 %v39_v31  ;;  %v2197_v28 = vld [vmem:[%s3182_s3 + $0x40] sm:$0xff]  ;;  %v2214_v31 = vld [vmem:[%s3182_s3 + $0xb0] sm:$0xff]  ;;  %v2230_v48 = vld [vmem:[%s3182_s3 + $0x98] sm:$0xff] }
  0x21   :  { %205 = vmatmul.f32.vlgmr.msra.gmra.mxu3 %v1877_v32  ;;  %111 = vmatmul.f32.vlgmr.msra.gmra.mxu0 %v1882_v33  ;;  %v43_v29 = vld [vmem:[%s3180_s2 + $0x20] sm:$0xff]  ;;  %v2223_v43 = vld [vmem:[%s3182_s3 + $0x10] sm:$0xff]  ;;  %v2248_v54 = vld [vmem:[%s3182_s3 + $0x68] sm:$0xff] }
  0x22   :  { %298 = vmatpush.msrb.mxu3 %v1887_v34  ;;  %338 = vmatpush.msrb.mxu0 %v1892_v35  ;;  %v2238_v51 = vld [vmem:[%s3182_s3 + $0x80] sm:$0xff]  ;;  %v2265_v58 = vld [vmem:[%s3182_s3 + $0x38] sm:$0xff] }
  0x23   :  { %192 = vmatpush.msra.mxu2 %v41_v30  ;;  %145 = vmatpush.msra.mxu1 %v58_v9  ;;  %v2208_v30 = vld [vmem:[%s3182_s3 + $0x28] sm:$0xff]  ;;  %v2274_v63 = vld [vmem:[%s3182_s3 + $0x20] sm:$0xff] }
  0x24   :  { %299 = vmatpush.msrb.mxu3 %v1899_v36  ;;  %339 = vmatpush.msrb.mxu0 %v1904_v37 }
  0x25   :  { %193 = vmatmul.f32.vlgmr.msra.gmra.mxu2 %v1882_v33  ;;  %146 = vmatpush.msra.mxu1 %v55_v15 }
  0x26   :  { %300 = vmatpush.msrb.mxu3 %v1911_v38  ;;  %340 = vmatpush.msrb.mxu0 %v1916_v39 }
  0x27   :  { %478 = vmatpush.msrb.mxu2 %v1951_v46  ;;  %147 = vmatpush.msra.mxu1 %v52_v19 }
  0x28   :  { %301 = vmatpush.msrb.mxu3 %v1926_v41  ;;  %341 = vmatpush.msrb.mxu0 %v1931_v42 }
  0x29   :  { %208 = vmatmul.f32.gmra.mxu3 %v1941_v44  ;;  %114 = vmatmul.f32.gmra.mxu0 %v1946_v45 }
  0x2a   :  { %302 = vmatpush.msrb.mxu3 %v1957_v47  ;;  %342 = vmatpush.msrb.mxu0 %v1975_v50 }
  0x2b   :  { %479 = vmatpush.msrb.mxu2 %v1984_v52  ;;  %148 = vmatpush.msra.mxu1 %v49_v23 }
  0x2c   :  { %303 = vmatpush.msrb.mxu3 %v1970_v49  ;;  %343 = vmatpush.msrb.mxu0 %v2010_v57 }
  0x2d   :  { %480 = vmatpush.msrb.mxu2 %v2000_v55  ;;  %149 = vmatpush.msra.mxu1 %v46_v27 }
  0x2e   :  { %304 = vmatpush.msrb.mxu3 %v1989_v53  ;;  %344 = vmatpush.msrb.mxu0 %v2046_v0 }
  0x2f   :  { %481 = vmatpush.msrb.mxu2 %v2030_v61  ;;  %150 = vmatpush.msra.mxu1 %v43_v29 }
  0x30   :  { %305 = vmatpush.msrb.mxu3 %v2005_v56  ;;  %196 = vmatmul.f32.gmra.mxu2 %v1946_v45 }
  0x31   :  { %211 = vmatmul.f32.gmra.mxu3 %v2020_v59  ;;  %117 = vmatmul.f32.gmra.mxu0 %v2025_v60 }
  0x32   :  { %306 = vmatpush.msrb.mxu3 %v2035_v62  ;;  %345 = vmatpush.msrb.mxu0 %v2062_v3 }
  0x33   :  { %482 = vmatpush.msrb.mxu2 %v2078_v6  ;;  %151 = vmatpush.msra.mxu1 %v40_v40 }
  0x34   :  { %307 = vmatpush.msrb.mxu3 %v2053_v1  ;;  %346 = vmatpush.msrb.mxu0 %v2083_v7 }
  0x35   :  { %483 = vmatpush.msrb.mxu2 %v2109_v12  ;;  %152 = vmatmul.f32.vlgmr.msra.gmra.mxu1 %v1882_v33  ;;  %v2256_v33 = vld [vmem:[%s3182_s3 + $0x50] sm:$0xff] }
  0x36   :  { %308 = vmatpush.msrb.mxu3 %v2067_v4  ;;  %347 = vmatpush.msrb.mxu0 %v2120_v14 }
  0x37   :  { %484 = vmatpush.msrb.mxu2 %v2143_v18  ;;  %458 = vmatpush.msrb.mxu1 %v1887_v34 }
  0x38   :  { %309 = vmatpush.msrb.mxu3 %v2088_v8  ;;  %348 = vmatpush.msrb.mxu0 %v2137_v17 }
  0x39   :  { %214 = vmatmul.f32.gmra.mxu3 %v2099_v10  ;;  %120 = vmatmul.f32.gmra.mxu0 %v2104_v11 }
  0x3a   :  { %310 = vmatpush.msrb.mxu3 %v2114_v13  ;;  %485 = vmatpush.msrb.mxu2 %v2164_v22 }
  0x3b   :  { %349 = vmatpush.msrb.mxu0 %v2157_v21  ;;  %199 = vmatmul.f32.gmra.mxu2 %v2025_v60 }
  0x3c   :  { %311 = vmatpush.msrb.mxu3 %v2132_v16  ;;  %486 = vmatpush.msrb.mxu2 %v2214_v31 }
  0x3d   :  { %350 = vmatpush.msrb.mxu0 %v2178_v25  ;;  %459 = vmatpush.msrb.mxu1 %v1899_v36 }
  0x3e   :  { %312 = vmatpush.msrb.mxu3 %v2152_v20  ;;  %487 = vmatpush.msrb.mxu2 %v2230_v48 }
  0x3f   :  { %351 = vmatpush.msrb.mxu0 %v2197_v28  ;;  %460 = vmatpush.msrb.mxu1 %v1911_v38 }
  0x40   :  { %313 = vmatpush.msrb.mxu3 %v2173_v24  ;;  %488 = vmatpush.msrb.mxu2 %v2238_v51 }
  0x41   :  { %123 = vmatmul.f32.gmra.mxu0 %v1877_v32  ;;  %314 = vmatmul.f32.vlgmr.msrb.gmra.mxu3 %v2186_v26 }
  0x42   :  { %318 = vmatpush.msra.mxu3 %v1951_v46  ;;  %352 = vmatpush.msrb.mxu0 %v2208_v30 }
  0x43   :  { %489 = vmatpush.msrb.mxu2 %v2248_v54  ;;  %155 = vmatmul.f32.gmra.mxu1 %v1946_v45 }
  0x44   :  { %319 = vmatpush.msra.mxu3 %v1984_v52  ;;  %353 = vmatpush.msrb.mxu0 %v2223_v43 }
  0x45   :  { %202 = vmatmul.f32.gmra.mxu2 %v2104_v11  ;;  %461 = vmatpush.msrb.mxu1 %v1926_v41 }
  0x46   :  { %320 = vmatpush.msra.mxu3 %v2000_v55  ;;  %490 = vmatpush.msrb.mxu2 %v2256_v33 }
  0x47   :  { %618 = vmatpush.msra.mxu0 %v1887_v34  ;;  %v2284_v34 = vld [vmem:[%s3182_s3 + $0x8] sm:$0xff]  ;;  %462 = vmatpush.msrb.mxu1 %v1957_v47 }
  0x48   :  { %321 = vmatpush.msra.mxu3 %v2030_v61  ;;  %491 = vmatpush.msrb.mxu2 %v2265_v58 }
  0x49   :  { %126 = vmatmul.f32.gmra.mxu0 %v1941_v44  ;;  %463 = vmatpush.msrb.mxu1 %v1970_v49 }
  0x4a   :  { %322 = vmatpush.msra.mxu3 %v2078_v6  ;;  %619 = vmatpush.msra.mxu0 %v1899_v36 }
  0x4b   :  { %492 = vmatpush.msrb.mxu2 %v2274_v63  ;;  %158 = vmatmul.f32.gmra.mxu1 %v2025_v60 }
  0x4c   :  { %323 = vmatpush.msra.mxu3 %v2109_v12  ;;  %620 = vmatpush.msra.mxu0 %v1911_v38 }
  0x4d   :  { %493 = vmatpush.msrb.mxu2 %v2284_v34  ;;  %464 = vmatpush.msrb.mxu1 %v1989_v53 }
  0x4e   :  { %324 = vmatpush.msra.mxu3 %v2143_v18  ;;  %621 = vmatpush.msra.mxu0 %v1926_v41 }
  0x4f   :  { %658 = vmatpush.msra.mxu2 %v1892_v35  ;;  %465 = vmatpush.msrb.mxu1 %v2005_v56 }
  0x50   :  { %325 = vmatpush.msra.mxu3 %v2164_v22  ;;  %622 = vmatpush.msra.mxu0 %v1957_v47 }
  0x51   :  { %129 = vmatmul.f32.gmra.mxu0 %v2020_v59  ;;  %659 = vmatpush.msra.mxu2 %v1904_v37 }
  0x52   :  { %326 = vmatpush.msra.mxu3 %v2214_v31  ;;  %623 = vmatpush.msra.mxu0 %v1970_v49 }
  0x53   :  { %660 = vmatpush.msra.mxu2 %v1916_v39  ;;  %466 = vmatpush.msrb.mxu1 %v2035_v62 }
  0x54   :  { %327 = vmatpush.msra.mxu3 %v2230_v48  ;;  %624 = vmatpush.msra.mxu0 %v1989_v53 }
  0x55   :  { %661 = vmatpush.msra.mxu2 %v1931_v42  ;;  %161 = vmatmul.f32.gmra.mxu1 %v2104_v11 }
  0x56   :  { %328 = vmatpush.msra.mxu3 %v2238_v51  ;;  %625 = vmatpush.msra.mxu0 %v2005_v56 }
  0x57   :  { %662 = vmatpush.msra.mxu2 %v1975_v50  ;;  %467 = vmatpush.msrb.mxu1 %v2053_v1 }
  0x58   :  { %329 = vmatpush.msra.mxu3 %v2248_v54  ;;  %626 = vmatpush.msra.mxu0 %v2035_v62 }
  0x59   :  { %132 = vmatmul.f32.gmra.mxu0 %v2099_v10  ;;  %663 = vmatpush.msra.mxu2 %v2010_v57 }
  0x5a   :  { %330 = vmatpush.msra.mxu3 %v2256_v33  ;;  %468 = vmatpush.msrb.mxu1 %v2067_v4 }
  0x5b   :  { %664 = vmatpush.msra.mxu2 %v2046_v0  ;;  %627 = vmatpush.msra.mxu0 %v2053_v1 }
  0x5c   :  { %331 = vmatpush.msra.mxu3 %v2265_v58  ;;  %469 = vmatpush.msrb.mxu1 %v2088_v8 }
  0x5d   :  { %665 = vmatpush.msra.mxu2 %v2062_v3  ;;  %628 = vmatpush.msra.mxu0 %v2067_v4 }
  0x5e   :  { %332 = vmatpush.msra.mxu3 %v2274_v63  ;;  %164 = vmatmul.f32.gmra.mxu1 %v1877_v32 }
  0x5f   :  { %666 = vmatpush.msra.mxu2 %v2083_v7  ;;  %470 = vmatpush.msrb.mxu1 %v2114_v13 }
  0x60   :  { %333 = vmatpush.msra.mxu3 %v2284_v34  ;;  %629 = vmatpush.msra.mxu0 %v2088_v8 }
  0x61   :  { %334 = vmatmul.f32.vlgmr.msra.gmra.mxu3 %v2186_v26  ;;  %354 = vmatmul.f32.vlgmr.msrb.gmra.mxu0 %v2186_v26 }
  0x62   :  { %498 = vmatpush.msrb.mxu3 %v1892_v35  ;;  %667 = vmatpush.msra.mxu2 %v2120_v14  ;;  %v87_v35 = vld [vmem:[%s3185_s4] sm:$0x7] }
  0x63   :  { %471 = vmatpush.msrb.mxu1 %v2132_v16  ;;  %630 = vmatpush.msra.mxu0 %v2114_v13 }
  0x64   :  { %499 = vmatpush.msrb.mxu3 %v1904_v37  ;;  %668 = vmatpush.msra.mxu2 %v2137_v17  ;;  %v89_v37 = vperm.slane %v87_v35, 0 }
  0x65   :  { %472 = vmatpush.msrb.mxu1 %v2152_v20  ;;  %631 = vmatpush.msra.mxu0 %v2132_v16 }
  0x66   :  { %500 = vmatpush.msrb.mxu3 %v1916_v39  ;;  %669 = vmatpush.msra.mxu2 %v2157_v21 }
  0x67   :  { %473 = vmatpush.msrb.mxu1 %v2173_v24  ;;  %632 = vmatpush.msra.mxu0 %v2152_v20 }
  0x68   :  { %501 = vmatpush.msrb.mxu3 %v1931_v42  ;;  %670 = vmatpush.msra.mxu2 %v2178_v25 }
  0x69   :  { %167 = vmatmul.f32.gmra.mxu1 %v1941_v44  ;;  %633 = vmatpush.msra.mxu0 %v2173_v24 }
  0x6a   :  { %502 = vmatpush.msrb.mxu3 %v1975_v50  ;;  %671 = vmatpush.msra.mxu2 %v2197_v28 }
  0x6b   :  { %638 = vmatpush.msra.mxu1 %v1951_v46 }
  0x6c   :  { %503 = vmatpush.msrb.mxu3 %v2010_v57  ;;  %672 = vmatpush.msra.mxu2 %v2208_v30 }
  0x6d   :  { %639 = vmatpush.msra.mxu1 %v1984_v52 }
  0x6e   :  { %504 = vmatpush.msrb.mxu3 %v2046_v0  ;;  %673 = vmatpush.msra.mxu2 %v2223_v43 }
  0x6f   :  { %640 = vmatpush.msra.mxu1 %v2000_v55 }
  0x70   :  { %505 = vmatpush.msrb.mxu3 %v2062_v3 }
  0x71   :  { %641 = vmatpush.msra.mxu1 %v2030_v61 }
  0x72   :  { %506 = vmatpush.msrb.mxu3 %v2083_v7  ;;  %170 = vmatmul.f32.gmra.mxu1 %v2020_v59 }
  0x73   :  { %642 = vmatpush.msra.mxu1 %v2078_v6  ;;  %v2403_v6 = vperm.slane %v87_v35, 1 }
  0x74   :  { %507 = vmatpush.msrb.mxu3 %v2120_v14 }
  0x75   :  { %643 = vmatpush.msra.mxu1 %v2109_v12 }
  0x76   :  { %508 = vmatpush.msrb.mxu3 %v2137_v17 }
  0x77   :  { %644 = vmatpush.msra.mxu1 %v2143_v18 }
  0x78   :  { %509 = vmatpush.msrb.mxu3 %v2157_v21 }
  0x79   :  { %645 = vmatpush.msra.mxu1 %v2164_v22  ;;  %v2409_v22 = vld [vmem:[%s3184_s5] ss:$0 sm:$0xff] }
  0x7a   :  { %510 = vmatpush.msrb.mxu3 %v2178_v25  ;;  %173 = vmatmul.f32.gmra.mxu1 %v2099_v10 }
  0x7b   :  { %646 = vmatpush.msra.mxu1 %v2214_v31 }
  0x7c   :  { %511 = vmatpush.msrb.mxu3 %v2197_v28 }
  0x7d   :  { %647 = vmatpush.msra.mxu1 %v2230_v48 }
  0x7e   :  { %512 = vmatpush.msrb.mxu3 %v2208_v30 }
  0x7f   :  { %648 = vmatpush.msra.mxu1 %v2238_v51 }
  0x80   :  { %513 = vmatpush.msrb.mxu3 %v2223_v43 }
  0x81   :  { %649 = vmatpush.msra.mxu1 %v2248_v54 }
  0x83   :  { %650 = vmatpush.msra.mxu1 %v2256_v33  ;;  %v2412_v33 = vperm.slane %v87_v35, 2 }
  0x85   :  { %651 = vmatpush.msra.mxu1 %v2265_v58 }
  0x87   :  { %652 = vmatpush.msra.mxu1 %v2274_v63 }
  0x89   :  { %653 = vmatpush.msra.mxu1 %v2284_v34 }
  0x9e   :  { %v112_v32 = vpop.f32.mrf.mxu0 }
  0x9f   :  { %v113_v53 = vadd.f32 %v112_v32, %v89_v37 }
  0xa4   :  { %v2381_v36 = vpop.f32.mrf.mxu3 }
  0xa6   :  { %v115_v38 = vpop.f32.mrf.mxu0 }
  0xa7   :  { %v2383_v39 = vadd.f32 %v115_v38, %v89_v37 }
  0xa8   :  { %v194_v54 = vpop.f32.mrf.mxu2 }
  0xa9   :  { %v195_v32 = vadd.f32 %v194_v54, %v2412_v33 }
  0xac   :  { %v2385_v41 = vpop.f32.mrf.mxu3 }
  0xad   :  { %3191 = vst [vmem:[#allocation4_spill] sm:$0xff] %v2385_v41 }
  0xae   :  { %v118_v42 = vpop.f32.mrf.mxu0 }
  0xaf   :  { %v2387_v44 = vadd.f32 %v118_v42, %v89_v37 }
  0xb2   :  { %v153_v9 = vpop.f32.mrf.mxu1 }
  0xb3   :  { %v154_v10 = vadd.f32 %v153_v9, %v2403_v6 }
  0xb4   :  { %v2389_v45 = vpop.f32.mrf.mxu3 }
  0xb5   :  { %3192 = vst [vmem:[#allocation5_spill] sm:$0xff] %v2389_v45 }
  0xb6   :  { %v121_v46 = vpop.f32.mrf.mxu0 }
  0xb7   :  { %v2391_v47 = vadd.f32 %v121_v46, %v89_v37 }
  0xbc   :  { %v2393_v49 = vpop.f32.mrf.mxu3 }
  0xbd   :  { %3193 = vst [vmem:[#allocation6_spill] sm:$0xff] %v2393_v49 }
  0xbe   :  { %v124_v50 = vpop.f32.mrf.mxu0 }
  0xbf   :  { %v2395_v52 = vadd.f32 %v124_v50, %v89_v37 }
  0xc0   :  { %v156_v9 = vpop.f32.mrf.mxu1 }
  0xc4   :  { %v315_v55 = vpop.f32.mrf.mxu3 }
  0xc5   :  { %v358_v56 = vadd.f32 %v315_v55, %v113_v53 }
  0xc6   :  { %v127_v57 = vpop.f32.mrf.mxu0 }
  0xc7   :  { %v2397_v59 = vadd.f32 %v127_v57, %v89_v37  ;;  %v1613_v60 = vmul.f32 -1.442695, %v358_v56 }
  0xc9   :  { %1647 = vpow2.f32 %v1613_v60 }
  0xce   :  { %v130_v61 = vpop.f32.mrf.mxu0 }
  0xcf   :  { %v2399_v62 = vadd.f32 %v130_v61, %v89_v37  ;;  %v1648_v1 = vpop.eup %1647 }
  0xd0   :  { %v362_v2 = vadd.f32 1.0, %v1648_v1 }
  0xd1   :  { %3194 = vst [vmem:[#allocation7_spill] sm:$0xff] %v2399_v62 }
  0xd2   :  { %1649 = vrcp.f32 %v362_v2  ;;  %v374_v20 = vand.u32 2147483648, %v362_v2  ;;  %vm368_vm1 = vweird.f32 %v362_v2  ;;  %v372_v23 = vand.u32 2147483647, %v362_v2 }
  0xd4   :  { %v375_v40 = vor.u32 1.1754944e-38, %v374_v20  ;;  %vm373_vm3 = vcmp.eq.f32.partialorder %v372_v23, 8.507059e+37 }
  0xd6   :  { %v133_v4 = vpop.f32.mrf.mxu0 }
  0xd7   :  { %v2401_v5 = vadd.f32 %v133_v4, %v89_v37 }
  0xd8   :  { %v1650_v8 = vpop.eup %1649 }
  0xd9   :  { %3195 = vst [vmem:[#allocation8_spill] sm:$0xff] %v2401_v5  ;;  %v364_v11 = vmul.f32 %v1650_v8, %v362_v2  ;;  %vm369_vm0 = vweird.f32 %v1650_v8 }
  0xda   :  { %vm370_vm2 = vmor %vm368_vm1, %vm369_vm0 }
  0xdb   :  { %v365_v13 = vsub.f32 1.0, %v364_v11 }
  0xdd   :  { %v366_v18 = vmul.f32 %v1650_v8, %v365_v13 }
  0xde   :  { %v355_v27 = vpop.f32.mrf.mxu0 }
  0xdf   :  { %v367_v19 = vadd.f32 %v1650_v8, %v366_v18  ;;  %v398_v48 = vadd.f32 %v2409_v22, %v355_v27  ;;  %v157_v27 = vadd.f32 %v156_v9, %v2403_v6 }
  0xe1   :  { %v371_v29 = vsel %vm370_vm2, %v1650_v8, %v367_v19 }
  0xe2   :  { %v376_v51 = vsel %vm373_vm3, %v375_v40, %v371_v29 }
  0xe3   :  { %v399_v58 = vmul.f32 %v398_v48, %v376_v51 }
  0xe4   :  { %v335_v12 = vpop.f32.mrf.mxu3 }
  0xe5   :  { %v378_v15 = vadd.f32 %v335_v12, %v154_v10  ;;  %v400_v42 = vadd.f32 %v399_v58, %v195_v32  ;;  %v2421_v10 = vpop.f32.mrf.mxu1 }
  0xe7   :  { %v1614_v16 = vmul.f32 -1.442695, %v378_v15  ;;  %v197_v15 = vpop.f32.mrf.mxu2 }
  0xe9   :  { %1651 = vpow2.f32 %v1614_v16 }
  0xed   :  { %v2423_v11 = vpop.f32.mrf.mxu1 }
  0xef   :  { %v1652_v24 = vpop.eup %1651 }
  0xf0   :  { %v382_v31 = vadd.f32 1.0, %v1652_v24 }
  0xf2   :  { %1653 = vrcp.f32 %v382_v31  ;;  %v394_v50 = vand.u32 2147483648, %v382_v31  ;;  %v392_v55 = vand.u32 2147483647, %v382_v31  ;;  %vm388_vm5 = vweird.f32 %v382_v31 }
  0xf3   :  { %1655 = vtanh.f32 %v400_v42 }
  0xf4   :  { %v395_v57 = vor.u32 1.1754944e-38, %v394_v50  ;;  %vm393_vm7 = vcmp.eq.f32.partialorder %v392_v55, 8.507059e+37 }
  0xf5   :  { %v2425_v12 = vpop.f32.mrf.mxu1 }
  0xf8   :  { %v1654_v37 = vpop.eup %1653 }
  0xf9   :  { %v384_v38 = vmul.f32 %v1654_v37, %v382_v31  ;;  %vm389_vm4 = vweird.f32 %v1654_v37  ;;  %v1656_v1 = vpop.eup %1655 }
  0xfa   :  { %vm390_vm6 = vmor %vm388_vm5, %vm389_vm4 }
  0xfb   :  { %v385_v46 = vsub.f32 1.0, %v384_v38 }
  0xfd   :  { %v386_v53 = vmul.f32 %v1654_v37, %v385_v46  ;;  %v2427_v13 = vpop.f32.mrf.mxu1 }
  0xff   :  { %v387_v56 = vadd.f32 %v1654_v37, %v386_v53 }
 0x101   :  { %v391_v60 = vsel %vm390_vm6, %v1654_v37, %v387_v56 }
 0x102   :  { %v396_v35 = vsel %vm393_vm7, %v395_v57, %v391_v60 }
 0x103   :  { %v402_v61 = vsub.f32 1.0, %v396_v35  ;;  %v404_v4 = vmul.f32 %v396_v35, %v2186_v26  ;;  %v2431_v26 = vpop.f32.mrf.mxu2 }
 0x105   :  { %v403_v2 = vmul.f32 %v1656_v1, %v402_v61  ;;  %v2429_v16 = vpop.f32.mrf.mxu1  ;;  %v198_v1 = vadd.f32 %v197_v15, %v2412_v33 }
 0x106   :  { %3197 = vst [vmem:[#allocation10_spill] sm:$0xff] %v2429_v16 }
 0x107   :  { %v2416_v8 = vadd.f32 %v404_v4, %v403_v2 }
 0x109   :  { %3196 = vst [vmem:[#allocation9_spill] sm:$0xff] %v2416_v8  ;;  %474 = vmatmul.f32.vlgmr.msrb.gmra.mxu1 %v2416_v8  ;;  %494 = vmatmul.f32.vlgmr.msrb.gmra.mxu2 %v2416_v8 }
 0x10a   :  { %514 = vmatmul.f32.vlgmr.msrb.gmra.mxu3 %v2416_v8 }
 0x10b   :  { %v2435_v19 = vpop.f32.mrf.mxu2 }
 0x10d   :  { %v2433_v18 = vpop.f32.mrf.mxu1 }
 0x10e   :  { %3198 = vst [vmem:[#allocation11_spill] sm:$0xff] %v2433_v18 }
 0x186   :  { %v475_v20 = vpop.f32.mrf.mxu1 }
 0x187   :  { %v518_v23 = vadd.f32 %v475_v20, %v2383_v39 }
 0x189   :  { %v1615_v24 = vmul.f32 -1.442695, %v518_v23 }
 0x18b   :  { %1657 = vpow2.f32 %v1615_v24 }
 0x18c   :  { %v495_v29 = vpop.f32.mrf.mxu2 }
 0x18d   :  { %v538_v31 = vadd.f32 %v495_v29, %v157_v27  ;;  %v515_v53 = vpop.f32.mrf.mxu3 }
 0x18e   :  { %v558_v61 = vadd.f32 %v2409_v22, %v515_v53  ;;  %v2492_v53 = vld [vmem:[%s3182_s3 + $0x140] sm:$0xff] }
 0x18f   :  { %v1616_v40 = vmul.f32 -1.442695, %v538_v31 }
 0x191   :  { %v1658_v48 = vpop.eup %1657  ;;  %1659 = vpow2.f32 %v1616_v40 }
 0x192   :  { %v522_v51 = vadd.f32 1.0, %v1658_v48 }
 0x194   :  { %1661 = vrcp.f32 %v522_v51  ;;  %v534_v42 = vand.u32 2147483648, %v522_v51  ;;  %v532_v39 = vand.u32 2147483647, %v522_v51  ;;  %vm528_vm9 = vweird.f32 %v522_v51 }
 0x196   :  { %v535_v57 = vor.u32 1.1754944e-38, %v534_v42  ;;  %vm533_vm11 = vcmp.eq.f32.partialorder %v532_v39, 8.507059e+37  ;;  %v2468_v42 = vld [vmem:[%s3182_s3 + $0x150] sm:$0xff]  ;;  %v2478_v39 = vld [vmem:[%s3182_s3 + $0x160] sm:$0xff] }
 0x197   :  { %v1660_v54 = vpop.eup %1659 }
 0x198   :  { %v542_v58 = vadd.f32 1.0, %v1660_v54 }
 0x19a   :  { %v1662_v32 = vpop.eup %1661  ;;  %1663 = vrcp.f32 %v542_v58  ;;  %v554_v9 = vand.u32 2147483648, %v542_v58  ;;  %v552_v23 = vand.u32 2147483647, %v542_v58  ;;  %vm548_vm13 = vweird.f32 %v542_v58 }
 0x19b   :  { %v524_v37 = vmul.f32 %v1662_v32, %v522_v51  ;;  %vm529_vm8 = vweird.f32 %v1662_v32 }
 0x19c   :  { %vm530_vm10 = vmor %vm528_vm9, %vm529_vm8  ;;  %v555_v29 = vor.u32 1.1754944e-38, %v554_v9  ;;  %vm553_vm15 = vcmp.eq.f32.partialorder %v552_v23, 8.507059e+37  ;;  %v2554_v9 = vld [vmem:[%s3182_s3 + $0x100] sm:$0xff] }
 0x19d   :  { %v525_v38 = vsub.f32 1.0, %v524_v37  ;;  %v2455_v37 = vld [vmem:[%s3182_s3 + $0x170] sm:$0xff]  ;;  %v2568_v23 = vld [vmem:[%s3182_s3 + $0xe0] sm:$0xff] }
 0x19e   :  { %798 = vmatpush.msrb.mxu0 %v2455_v37 }
 0x19f   :  { %v526_v46 = vmul.f32 %v1662_v32, %v525_v38  ;;  %v2460_v38 = vld [vmem:[%s3182_s3 + $0x178] sm:$0xff] }
 0x1a0   :  { %v1664_v50 = vpop.eup %1663  ;;  %818 = vmatpush.msrb.mxu1 %v2460_v38 }
 0x1a1   :  { %v544_v55 = vmul.f32 %v1664_v50, %v542_v58  ;;  %v527_v56 = vadd.f32 %v1662_v32, %v526_v46  ;;  %vm549_vm12 = vweird.f32 %v1664_v50  ;;  %v2450_v58 = vld [vmem:[%s3182_s3 + $0x168] sm:$0xff]  ;;  %v2473_v46 = vld [vmem:[%s3182_s3 + $0x158] sm:$0xff] }
 0x1a2   :  { %vm550_vm14 = vmor %vm548_vm13, %vm549_vm12  ;;  %778 = vmatpush.msra.mxu3 %v2450_v58  ;;  %938 = vmatpush.msrb.mxu2 %v2450_v58 }
 0x1a3   :  { %v545_v60 = vsub.f32 1.0, %v544_v55  ;;  %v531_v35 = vsel %vm530_vm10, %v1662_v32, %v527_v56  ;;  %799 = vmatpush.msrb.mxu0 %v2473_v46  ;;  %819 = vmatpush.msrb.mxu1 %v2478_v39  ;;  %v2497_v55 = vld [vmem:[%s3182_s3 + $0x148] sm:$0xff]  ;;  %v2506_v56 = vld [vmem:[%s3182_s3 + $0x120] sm:$0xff] }
 0x1a4   :  { %v536_v2 = vsel %vm533_vm11, %v535_v57, %v531_v35  ;;  %779 = vmatpush.msra.mxu3 %v2468_v42  ;;  %939 = vmatpush.msrb.mxu2 %v2468_v42  ;;  %v2511_v57 = vld [vmem:[%s3182_s3 + $0x128] sm:$0xff] }
 0x1a5   :  { %v546_v4 = vmul.f32 %v1664_v50, %v545_v60  ;;  %v559_v20 = vmul.f32 %v558_v61, %v536_v2  ;;  %800 = vmatpush.msrb.mxu0 %v2492_v53  ;;  %820 = vmatpush.msrb.mxu1 %v2497_v55  ;;  %v2516_v60 = vld [vmem:[%s3182_s3 + $0x130] sm:$0xff]  ;;  %v2525_v35 = vld [vmem:[%s3182_s3 + $0x108] sm:$0xff] }
 0x1a6   :  { %v2530_v61 = vld [vmem:[%s3182_s3 + $0x110] sm:$0xff] }
 0x1a7   :  { %v547_v24 = vadd.f32 %v1664_v50, %v546_v4  ;;  %v560_v27 = vadd.f32 %v559_v20, %v198_v1  ;;  %801 = vmatpush.msrb.mxu0 %v2511_v57  ;;  %821 = vmatpush.msrb.mxu1 %v2516_v60  ;;  %v2535_v1 = vld [vmem:[%s3182_s3 + $0x118] sm:$0xff]  ;;  %v2544_v2 = vld [vmem:[%s3182_s3 + $0xf0] sm:$0xff] }
 0x1a8   :  { %v2549_v4 = vld [vmem:[%s3182_s3 + $0xf8] sm:$0xff] }
 0x1a9   :  { %v551_v31 = vsel %vm550_vm14, %v1664_v50, %v547_v24  ;;  %1665 = vtanh.f32 %v560_v27  ;;  %v2487_v50 = vld [vmem:[%s3182_s3 + $0x138] sm:$0xff]  ;;  %802 = vmatpush.msrb.mxu0 %v2530_v61  ;;  %822 = vmatpush.msrb.mxu1 %v2535_v1  ;;  %v2577_v24 = vld [vmem:[%s3182_s3 + $0xc0] sm:$0xff]  ;;  %v2582_v27 = vld [vmem:[%s3182_s3 + $0xc8] sm:$0xff] }
 0x1aa   :  { %v556_v40 = vsel %vm553_vm15, %v555_v29, %v551_v31  ;;  %780 = vmatpush.msra.mxu3 %v2487_v50  ;;  %940 = vmatpush.msrb.mxu2 %v2487_v50  ;;  %v2563_v20 = vld [vmem:[%s3182_s3 + $0xd8] sm:$0xff]  ;;  %v160_v29 = vadd.f32 %v2421_v10, %v2403_v6  ;;  %v2598_v31 = vld [vmem:[%s3182_s3 + $0xb0] sm:$0xff] }
 0x1ab   :  { %v562_v48 = vsub.f32 1.0, %v556_v40  ;;  %v564_v15 = vmul.f32 %v556_v40, %v2416_v8  ;;  %803 = vmatpush.msrb.mxu0 %v2549_v4  ;;  %823 = vmatpush.msrb.mxu1 %v2554_v9 }
 0x1ac   :  { %781 = vmatpush.msra.mxu3 %v2506_v56  ;;  %941 = vmatpush.msrb.mxu2 %v2506_v56 }
 0x1ad   :  { %804 = vmatpush.msrb.mxu0 %v2568_v23  ;;  %824 = vmatpush.msrb.mxu1 %v2046_v0  ;;  %v2593_v0 = vld [vmem:[%s3182_s3 + $0xa8] sm:$0xff] }
 0x1ae   :  { %782 = vmatpush.msra.mxu3 %v2525_v35  ;;  %942 = vmatpush.msrb.mxu2 %v2525_v35 }
 0x1af   :  { %v1666_v51 = vpop.eup %1665  ;;  %805 = vmatpush.msrb.mxu0 %v2582_v27  ;;  %825 = vmatpush.msrb.mxu1 %v2062_v3 }
 0x1b0   :  { %v563_v54 = vmul.f32 %v1666_v51, %v562_v48  ;;  %783 = vmatpush.msra.mxu3 %v2544_v2  ;;  %943 = vmatpush.msrb.mxu2 %v2544_v2  ;;  %v2608_v51 = vld [vmem:[%s3182_s3 + $0x90] sm:$0xff] }
 0x1b1   :  { %806 = vmatpush.msrb.mxu0 %v2598_v31  ;;  %826 = vmatpush.msrb.mxu1 %v2083_v7  ;;  %v2622_v7 = vld [vmem:[%s3182_s3 + $0x78] sm:$0xff] }
 0x1b2   :  { %v2442_v32 = vadd.f32 %v564_v15, %v563_v54  ;;  %784 = vmatpush.msra.mxu3 %v2563_v20  ;;  %944 = vmatpush.msrb.mxu2 %v2563_v20  ;;  %v2613_v54 = vld [vmem:[%s3182_s3 + $0x98] sm:$0xff] }
 0x1b3   :  { %807 = vmatpush.msrb.mxu0 %v2613_v54  ;;  %827 = vmatpush.msrb.mxu1 %v2120_v14  ;;  %v2636_v14 = vld [vmem:[%s3182_s3 + $0x60] sm:$0xff] }
 0x1b4   :  { %634 = vmatmul.f32.vlgmr.msra.gmra.mxu0 %v2442_v32  ;;  %654 = vmatmul.f32.vlgmr.msra.gmra.mxu1 %v2442_v32 }
 0x1b5   :  { %674 = vmatmul.f32.vlgmr.msra.gmra.mxu2 %v2442_v32  ;;  %785 = vmatpush.msra.mxu3 %v2577_v24 }
 0x1b6   :  { %945 = vmatpush.msrb.mxu2 %v2577_v24  ;;  %828 = vmatpush.msrb.mxu1 %v2137_v17  ;;  %v2650_v17 = vld [vmem:[%s3182_s3 + $0x48] sm:$0xff] }
 0x1b7   :  { %786 = vmatpush.msra.mxu3 %v2593_v0 }
 0x1b8   :  { %946 = vmatpush.msrb.mxu2 %v2593_v0  ;;  %829 = vmatpush.msrb.mxu1 %v2157_v21  ;;  %v2664_v21 = vld [vmem:[%s3182_s3 + $0x30] sm:$0xff] }
 0x1b9   :  { %787 = vmatpush.msra.mxu3 %v2608_v51 }
 0x1ba   :  { %947 = vmatpush.msrb.mxu2 %v2608_v51  ;;  %830 = vmatpush.msrb.mxu1 %v2178_v25  ;;  %v2677_v25 = vld [vmem:[%s3182_s3 + $0x18] sm:$0xff] }
 0x1bb   :  { %788 = vmatpush.msra.mxu3 %v2622_v7 }
 0x1bc   :  { %948 = vmatpush.msrb.mxu2 %v2622_v7  ;;  %831 = vmatpush.msrb.mxu1 %v2197_v28 }
 0x1bd   :  { %789 = vmatpush.msra.mxu3 %v2636_v14 }
 0x1be   :  { %949 = vmatpush.msrb.mxu2 %v2636_v14  ;;  %832 = vmatpush.msrb.mxu1 %v2208_v30 }
 0x1bf   :  { %790 = vmatpush.msra.mxu3 %v2650_v17 }
 0x1c0   :  { %950 = vmatpush.msrb.mxu2 %v2650_v17  ;;  %833 = vmatpush.msrb.mxu1 %v2223_v43 }
 0x1c1   :  { %791 = vmatpush.msra.mxu3 %v2664_v21 }
 0x1c2   :  { %951 = vmatpush.msrb.mxu2 %v2664_v21  ;;  %1098 = vmatpush.msra.mxu1 %v2450_v58 }
 0x1c3   :  { %792 = vmatpush.msra.mxu3 %v2677_v25 }
 0x1c4   :  { %952 = vmatpush.msrb.mxu2 %v2677_v25  ;;  %1099 = vmatpush.msra.mxu1 %v2468_v42 }
 0x1c6   :  { %1100 = vmatpush.msra.mxu1 %v2487_v50 }
 0x1c8   :  { %1101 = vmatpush.msra.mxu1 %v2506_v56 }
 0x1ca   :  { %1102 = vmatpush.msra.mxu1 %v2525_v35 }
 0x1cc   :  { %1103 = vmatpush.msra.mxu1 %v2544_v2 }
 0x1ce   :  { %1104 = vmatpush.msra.mxu1 %v2563_v20 }
 0x1d0   :  { %1105 = vmatpush.msra.mxu1 %v2577_v24 }
 0x1d2   :  { %1106 = vmatpush.msra.mxu1 %v2593_v0 }
 0x1d4   :  { %1107 = vmatpush.msra.mxu1 %v2608_v51 }
 0x1d6   :  { %1108 = vmatpush.msra.mxu1 %v2622_v7 }
 0x1d8   :  { %1109 = vmatpush.msra.mxu1 %v2636_v14 }
 0x1da   :  { %1110 = vmatpush.msra.mxu1 %v2650_v17 }
 0x1dc   :  { %1111 = vmatpush.msra.mxu1 %v2664_v21 }
 0x1de   :  { %1112 = vmatpush.msra.mxu1 %v2677_v25 }
 0x231   :  { %v635_v40 = vpop.f32.mrf.mxu0  ;;  %v655_v48 = vpop.f32.mrf.mxu1 }
 0x232   :  { %v678_v3 = vadd.f32 %v635_v40, %v2387_v44  ;;  %v698_v10 = vadd.f32 %v655_v48, %v160_v29  ;;  %v2627_v29 = vld [vmem:[%s3182_s3 + $0x80] sm:$0xff]  ;;  %v2641_v40 = vld [vmem:[%s3182_s3 + $0x68] sm:$0xff]  ;;  %v2655_v48 = vld [vmem:[%s3182_s3 + $0x50] sm:$0xff] }
 0x233   :  { %808 = vmatpush.msrb.mxu0 %v2627_v29 }
 0x234   :  { %v1617_v44 = vmul.f32 -1.442695, %v678_v3  ;;  %v1618_v15 = vmul.f32 -1.442695, %v698_v10  ;;  %v2669_v3 = vld [vmem:[%s3182_s3 + $0x38] sm:$0xff] }
 0x235   :  { %809 = vmatpush.msrb.mxu0 %v2641_v40 }
 0x236   :  { %1667 = vpow2.f32 %v1617_v44  ;;  %v2683_v44 = vld [vmem:[%s3182_s3] sm:$0xff] }
 0x237   :  { %1669 = vpow2.f32 %v1618_v15  ;;  %810 = vmatpush.msrb.mxu0 %v2655_v48  ;;  %793 = vmatpush.msra.mxu3 %v2683_v44 }
 0x238   :  { %953 = vmatpush.msrb.mxu2 %v2683_v44  ;;  %v675_v16 = vpop.f32.mrf.mxu2  ;;  %1113 = vmatpush.msra.mxu1 %v2683_v44 }
 0x239   :  { %811 = vmatpush.msrb.mxu0 %v2669_v3  ;;  %958 = vmatpush.msrb.mxu3 %v2455_v37  ;;  %v718_v8 = vadd.f32 %v2409_v22, %v675_v16 }
 0x23a   :  { %1118 = vmatpush.msra.mxu2 %v2455_v37 }
 0x23b   :  { %812 = vmatpush.msrb.mxu0 %v2274_v63  ;;  %959 = vmatpush.msrb.mxu3 %v2473_v46 }
 0x23c   :  { %v1668_v10 = vpop.eup %1667  ;;  %1119 = vmatpush.msra.mxu2 %v2473_v46 }
 0x23d   :  { %v1670_v15 = vpop.eup %1669  ;;  %v682_v49 = vadd.f32 1.0, %v1668_v10  ;;  %813 = vmatpush.msrb.mxu0 %v2284_v34  ;;  %960 = vmatpush.msrb.mxu3 %v2492_v53 }
 0x23e   :  { %v2688_v5 = vadd.f32 1.0, %v1670_v15  ;;  %1120 = vmatpush.msra.mxu2 %v2492_v53 }
 0x23f   :  { %1671 = vrcp.f32 %v682_v49  ;;  %978 = vmatpush.msra.mxu0 %v2460_v38  ;;  %961 = vmatpush.msrb.mxu3 %v2511_v57  ;;  %v694_v15 = vand.u32 2147483648, %v682_v49  ;;  %v692_v45 = vand.u32 2147483647, %v682_v49  ;;  %vm688_vm1 = vweird.f32 %v682_v49 }
 0x240   :  { %1673 = vrcp.f32 %v2688_v5  ;;  %1121 = vmatpush.msra.mxu2 %v2511_v57  ;;  %vm708_vm5 = vweird.f32 %v2688_v5 }
 0x241   :  { %979 = vmatpush.msra.mxu0 %v2478_v39  ;;  %962 = vmatpush.msrb.mxu3 %v2530_v61  ;;  %vm693_vm3 = vcmp.eq.f32.partialorder %v692_v45, 8.507059e+37  ;;  %v712_v45 = vand.u32 2147483647, %v2688_v5 }
 0x242   :  { %1122 = vmatpush.msra.mxu2 %v2530_v61 }
 0x243   :  { %980 = vmatpush.msra.mxu0 %v2497_v55  ;;  %963 = vmatpush.msrb.mxu3 %v2549_v4  ;;  %vm713_vm7 = vcmp.eq.f32.partialorder %v712_v45, 8.507059e+37 }
 0x244   :  { %1123 = vmatpush.msra.mxu2 %v2549_v4 }
 0x245   :  { %v1672_v28 = vpop.eup %1671  ;;  %981 = vmatpush.msra.mxu0 %v2516_v60  ;;  %964 = vmatpush.msrb.mxu3 %v2568_v23 }
 0x246   :  { %v1674_v30 = vpop.eup %1673  ;;  %v684_v43 = vmul.f32 %v1672_v28, %v682_v49  ;;  %vm689_vm0 = vweird.f32 %v1672_v28  ;;  %1124 = vmatpush.msra.mxu2 %v2568_v23  ;;  %v201_v49 = vadd.f32 %v2431_v26, %v2412_v33 }
 0x247   :  { %v704_v63 = vmul.f32 %v1674_v30, %v2688_v5  ;;  %982 = vmatpush.msra.mxu0 %v2535_v1  ;;  %vm690_vm2 = vmor %vm688_vm1, %vm689_vm0  ;;  %965 = vmatpush.msrb.mxu3 %v2582_v27  ;;  %vm709_vm4 = vweird.f32 %v1674_v30 }
 0x248   :  { %v685_v34 = vsub.f32 1.0, %v684_v43  ;;  %1125 = vmatpush.msra.mxu2 %v2582_v27  ;;  %vm710_vm6 = vmor %vm708_vm5, %vm709_vm4 }
 0x249   :  { %v705_v10 = vsub.f32 1.0, %v704_v63  ;;  %983 = vmatpush.msra.mxu0 %v2554_v9  ;;  %v695_v63 = vor.u32 1.1754944e-38, %v694_v15  ;;  %v714_v15 = vand.u32 2147483648, %v2688_v5  ;;  %966 = vmatpush.msrb.mxu3 %v2598_v31 }
 0x24a   :  { %v686_v18 = vmul.f32 %v1672_v28, %v685_v34  ;;  %1126 = vmatpush.msra.mxu2 %v2598_v31 }
 0x24b   :  { %v706_v62 = vmul.f32 %v1674_v30, %v705_v10  ;;  %967 = vmatpush.msrb.mxu3 %v2613_v54 }
 0x24c   :  { %v687_v43 = vadd.f32 %v1672_v28, %v686_v18  ;;  %1127 = vmatpush.msra.mxu2 %v2613_v54 }
 0x24d   :  { %v707_v10 = vadd.f32 %v1674_v30, %v706_v62  ;;  %968 = vmatpush.msrb.mxu3 %v2627_v29 }
 0x24e   :  { %v691_v34 = vsel %vm690_vm2, %v1672_v28, %v687_v43  ;;  %1128 = vmatpush.msra.mxu2 %v2627_v29 }
 0x24f   :  { %v696_v18 = vsel %vm693_vm3, %v695_v63, %v691_v34  ;;  %v711_v16 = vsel %vm710_vm6, %v1674_v30, %v707_v10  ;;  %969 = vmatpush.msrb.mxu3 %v2641_v40  ;;  %v2829_v63 = vld [vmem:[%s3182_s3 + $0x58] sm:$0xff]  ;;  %v2840_v10 = vld [vmem:[%s3182_s3 + $0x40] sm:$0xff] }
 0x250   :  { %v719_v41 = vmul.f32 %v718_v8, %v696_v18  ;;  %v715_v8 = vor.u32 1.1754944e-38, %v714_v15  ;;  %1129 = vmatpush.msra.mxu2 %v2641_v40  ;;  %v2848_v18 = vld [vmem:[%s3182_s3 + $0x28] sm:$0xff]  ;;  %v2855_v15 = vld [vmem:[%s3182_s3 + $0x10] sm:$0xff] }
 0x251   :  { %970 = vmatpush.msrb.mxu3 %v2655_v48 }
 0x252   :  { %v720_v62 = vadd.f32 %v719_v41, %v201_v49  ;;  %v716_v5 = vsel %vm713_vm7, %v715_v8, %v711_v16  ;;  %1130 = vmatpush.msra.mxu2 %v2655_v48 }
 0x253   :  { %v722_v41 = vsub.f32 1.0, %v716_v5  ;;  %971 = vmatpush.msrb.mxu3 %v2669_v3  ;;  %v724_v30 = vmul.f32 %v716_v5, %v2442_v32 }
 0x254   :  { %1675 = vtanh.f32 %v720_v62  ;;  %1131 = vmatpush.msra.mxu2 %v2669_v3 }
 0x25a   :  { %v1676_v26 = vpop.eup %1675 }
 0x25b   :  { %v723_v28 = vmul.f32 %v1676_v26, %v722_v41 }
 0x25d   :  { %v2752_v43 = vadd.f32 %v724_v30, %v723_v28 }
 0x25f   :  { %794 = vmatmul.f32.vlgmr.msra.gmra.mxu3 %v2752_v43  ;;  %814 = vmatmul.f32.vlgmr.msrb.gmra.mxu0 %v2752_v43 }
 0x260   :  { %834 = vmatmul.f32.vlgmr.msrb.gmra.mxu1 %v2752_v43 }
 0x261   :  { %1278 = vmatpush.msrb.mxu1 %v2455_v37  ;;  %v163_v37 = vadd.f32 %v2423_v11, %v2403_v6  ;;  %v2791_v11 = vld [vmem:[%s3182_s3 + $0xb8] sm:$0xff] }
 0x263   :  { %1279 = vmatpush.msrb.mxu1 %v2473_v46 }
 0x265   :  { %1280 = vmatpush.msrb.mxu1 %v2492_v53 }
 0x267   :  { %1281 = vmatpush.msrb.mxu1 %v2511_v57  ;;  %v2779_v57 = vld [vmem:[%s3182_s3 + $0xe8] sm:$0xff] }
 0x268   :  { %984 = vmatpush.msra.mxu0 %v2779_v57 }
 0x269   :  { %1282 = vmatpush.msrb.mxu1 %v2530_v61 }
 0x26b   :  { %1283 = vmatpush.msrb.mxu1 %v2549_v4  ;;  %v2785_v4 = vld [vmem:[%s3182_s3 + $0xd0] sm:$0xff] }
 0x26c   :  { %985 = vmatpush.msra.mxu0 %v2785_v4 }
 0x26d   :  { %1284 = vmatpush.msrb.mxu1 %v2568_v23  ;;  %v2796_v23 = vld [vmem:[%s3182_s3 + $0xa0] sm:$0xff] }
 0x26e   :  { %986 = vmatpush.msra.mxu0 %v2791_v11 }
 0x26f   :  { %1285 = vmatpush.msrb.mxu1 %v2582_v27 }
 0x270   :  { %987 = vmatpush.msra.mxu0 %v2796_v23 }
 0x271   :  { %1286 = vmatpush.msrb.mxu1 %v2598_v31 }
 0x273   :  { %1287 = vmatpush.msrb.mxu1 %v2613_v54  ;;  %v2803_v54 = vld [vmem:[%s3182_s3 + $0x88] sm:$0xff] }
 0x274   :  { %988 = vmatpush.msra.mxu0 %v2803_v54 }
 0x275   :  { %1288 = vmatpush.msrb.mxu1 %v2627_v29  ;;  %v2808_v29 = vld [vmem:[%s3182_s3 + $0x20] sm:$0xff] }
 0x276   :  { %972 = vmatpush.msrb.mxu3 %v2808_v29  ;;  %1132 = vmatpush.msra.mxu2 %v2808_v29 }
 0x277   :  { %1289 = vmatpush.msrb.mxu1 %v2641_v40  ;;  %v2813_v40 = vld [vmem:[%s3182_s3 + $0x8] sm:$0xff] }
 0x278   :  { %973 = vmatpush.msrb.mxu3 %v2813_v40  ;;  %1133 = vmatpush.msra.mxu2 %v2813_v40 }
 0x279   :  { %1290 = vmatpush.msrb.mxu1 %v2655_v48  ;;  %v2820_v48 = vld [vmem:[%s3182_s3 + $0x70] sm:$0xff] }
 0x27a   :  { %1138 = vmatpush.msra.mxu3 %v2460_v38  ;;  %989 = vmatpush.msra.mxu0 %v2820_v48 }
 0x27b   :  { %1291 = vmatpush.msrb.mxu1 %v2669_v3 }
 0x27c   :  { %1139 = vmatpush.msra.mxu3 %v2478_v39  ;;  %990 = vmatpush.msra.mxu0 %v2829_v63 }
 0x27d   :  { %1292 = vmatpush.msrb.mxu1 %v2808_v29 }
 0x27e   :  { %1140 = vmatpush.msra.mxu3 %v2497_v55  ;;  %991 = vmatpush.msra.mxu0 %v2840_v10 }
 0x27f   :  { %1293 = vmatpush.msrb.mxu1 %v2813_v40 }
 0x280   :  { %1141 = vmatpush.msra.mxu3 %v2516_v60  ;;  %992 = vmatpush.msra.mxu0 %v2848_v18 }
 0x282   :  { %1142 = vmatpush.msra.mxu3 %v2535_v1  ;;  %993 = vmatpush.msra.mxu0 %v2855_v15 }
 0x284   :  { %1143 = vmatpush.msra.mxu3 %v2554_v9  ;;  %1258 = vmatpush.msrb.mxu0 %v2450_v58 }
 0x286   :  { %1144 = vmatpush.msra.mxu3 %v2779_v57  ;;  %1259 = vmatpush.msrb.mxu0 %v2468_v42 }
 0x288   :  { %1145 = vmatpush.msra.mxu3 %v2785_v4  ;;  %1260 = vmatpush.msrb.mxu0 %v2487_v50 }
 0x28a   :  { %1146 = vmatpush.msra.mxu3 %v2791_v11  ;;  %1261 = vmatpush.msrb.mxu0 %v2506_v56 }
 0x28c   :  { %1147 = vmatpush.msra.mxu3 %v2796_v23  ;;  %1262 = vmatpush.msrb.mxu0 %v2525_v35 }
 0x28e   :  { %1148 = vmatpush.msra.mxu3 %v2803_v54  ;;  %1263 = vmatpush.msrb.mxu0 %v2544_v2 }
 0x290   :  { %1149 = vmatpush.msra.mxu3 %v2820_v48  ;;  %1264 = vmatpush.msrb.mxu0 %v2563_v20 }
 0x292   :  { %1150 = vmatpush.msra.mxu3 %v2829_v63  ;;  %1265 = vmatpush.msrb.mxu0 %v2577_v24 }
 0x294   :  { %1151 = vmatpush.msra.mxu3 %v2840_v10  ;;  %1266 = vmatpush.msrb.mxu0 %v2593_v0 }
 0x296   :  { %1152 = vmatpush.msra.mxu3 %v2848_v18  ;;  %1267 = vmatpush.msrb.mxu0 %v2608_v51 }
 0x298   :  { %1153 = vmatpush.msra.mxu3 %v2855_v15  ;;  %1268 = vmatpush.msrb.mxu0 %v2622_v7 }
 0x29a   :  { %1269 = vmatpush.msrb.mxu0 %v2636_v14 }
 0x29c   :  { %1270 = vmatpush.msrb.mxu0 %v2650_v17 }
 0x29e   :  { %1271 = vmatpush.msrb.mxu0 %v2664_v21 }
 0x2a0   :  { %1272 = vmatpush.msrb.mxu0 %v2677_v25 }
 0x2a2   :  { %1273 = vmatpush.msrb.mxu0 %v2683_v44 }
 0x2dc   :  { %v815_v46 = vpop.f32.mrf.mxu0 }
 0x2dd   :  { %v858_v53 = vadd.f32 %v815_v46, %v163_v37  ;;  %v835_v30 = vpop.f32.mrf.mxu1 }
 0x2de   :  { %v878_v35 = vadd.f32 %v2409_v22, %v835_v30 }
 0x2df   :  { %v1620_v61 = vmul.f32 -1.442695, %v858_v53 }
 0x2e1   :  { %1677 = vpow2.f32 %v1620_v61  ;;  %v204_v61 = vadd.f32 %v2435_v19, %v2412_v33 }
 0x2e2   :  { %v795_v27 = vpop.f32.mrf.mxu3 }
 0x2e3   :  { %v838_v31 = vadd.f32 %v795_v27, %v2391_v47 }
 0x2e5   :  { %v1619_v47 = vmul.f32 -1.442695, %v838_v31 }
 0x2e7   :  { %v1678_v3 = vpop.eup %1677  ;;  %1679 = vpow2.f32 %v1619_v47 }
 0x2e8   :  { %v2833_v34 = vadd.f32 1.0, %v1678_v3 }
 0x2ea   :  { %1681 = vrcp.f32 %v2833_v34  ;;  %v874_v27 = vand.u32 2147483648, %v2833_v34  ;;  %vm868_vm13 = vweird.f32 %v2833_v34  ;;  %v872_v20 = vand.u32 2147483647, %v2833_v34 }
 0x2ec   :  { %v875_v3 = vor.u32 1.1754944e-38, %v874_v27  ;;  %vm873_vm15 = vcmp.eq.f32.partialorder %v872_v20, 8.507059e+37 }
 0x2ed   :  { %v1680_v49 = vpop.eup %1679 }
 0x2ee   :  { %v842_v45 = vadd.f32 1.0, %v1680_v49 }
 0x2f0   :  { %1683 = vrcp.f32 %v842_v45  ;;  %v1682_v62 = vpop.eup %1681  ;;  %v854_v58 = vand.u32 2147483648, %v842_v45  ;;  %v852_v28 = vand.u32 2147483647, %v842_v45  ;;  %vm848_vm9 = vweird.f32 %v842_v45 }
 0x2f1   :  { %v864_v16 = vmul.f32 %v1682_v62, %v2833_v34  ;;  %vm869_vm12 = vweird.f32 %v1682_v62 }
 0x2f2   :  { %v855_v56 = vor.u32 1.1754944e-38, %v854_v58  ;;  %vm853_vm11 = vcmp.eq.f32.partialorder %v852_v28, 8.507059e+37  ;;  %vm870_vm14 = vmor %vm868_vm13, %vm869_vm12 }
 0x2f3   :  { %v865_v41 = vsub.f32 1.0, %v864_v16 }
 0x2f5   :  { %v866_v50 = vmul.f32 %v1682_v62, %v865_v41 }
 0x2f6   :  { %v1684_v8 = vpop.eup %1683 }
 0x2f7   :  { %v844_v5 = vmul.f32 %v1684_v8, %v842_v45  ;;  %vm849_vm8 = vweird.f32 %v1684_v8  ;;  %v867_v53 = vadd.f32 %v1682_v62, %v866_v50 }
 0x2f8   :  { %vm850_vm10 = vmor %vm848_vm9, %vm849_vm8 }
 0x2f9   :  { %v845_v26 = vsub.f32 1.0, %v844_v5  ;;  %v871_v24 = vsel %vm870_vm14, %v1682_v62, %v867_v53 }
 0x2fa   :  { %v876_v19 = vsel %vm873_vm15, %v875_v3, %v871_v24 }
 0x2fb   :  { %v846_v42 = vmul.f32 %v1684_v8, %v845_v26  ;;  %v882_v0 = vsub.f32 1.0, %v876_v19  ;;  %v884_v51 = vmul.f32 %v876_v19, %v2752_v43 }
 0x2fd   :  { %v847_v37 = vadd.f32 %v1684_v8, %v846_v42 }
 0x2ff   :  { %v851_v46 = vsel %vm850_vm10, %v1684_v8, %v847_v37 }
 0x300   :  { %v856_v2 = vsel %vm853_vm11, %v855_v56, %v851_v46  ;;  %v207_v46 = vadd.f32 %v2381_v36, %v2412_v33  ;;  %v1551_v36 = vld [vmem:[%s3186_s6 + $0x78] sm:$0xff] }
 0x301   :  { %v879_v31 = vmul.f32 %v878_v35, %v856_v2 }
 0x303   :  { %v880_v47 = vadd.f32 %v879_v31, %v204_v61 }
 0x305   :  { %1685 = vtanh.f32 %v880_v47 }
 0x30b   :  { %v1686_v34 = vpop.eup %1685 }
 0x30c   :  { %v883_v49 = vmul.f32 %v1686_v34, %v882_v0  ;;  %v1550_v34 = vld [vmem:[%s3186_s6 + $0x70] sm:$0xff] }
 0x30e   :  { %v2895_v45 = vadd.f32 %v884_v51, %v883_v49  ;;  %v1549_v49 = vld [vmem:[%s3186_s6 + $0x68] sm:$0xff]  ;;  %v1548_v51 = vld [vmem:[%s3186_s6 + $0x60] sm:$0xff] }
 0x310   :  { %954 = vmatmul.f32.vlgmr.msrb.gmra.mxu2 %v2895_v45  ;;  %974 = vmatmul.f32.vlgmr.msrb.gmra.mxu3 %v2895_v45 }
 0x311   :  { %994 = vmatmul.f32.vlgmr.msra.gmra.mxu0 %v2895_v45  ;;  %1298 = vmatpush.msrb.mxu2 %v2460_v38  ;;  %v166_v38 = vadd.f32 %v2425_v12, %v2403_v6 }
 0x313   :  { %1299 = vmatpush.msrb.mxu2 %v2478_v39 }
 0x315   :  { %1300 = vmatpush.msrb.mxu2 %v2497_v55 }
 0x317   :  { %1301 = vmatpush.msrb.mxu2 %v2516_v60 }
 0x319   :  { %1302 = vmatpush.msrb.mxu2 %v2535_v1 }
 0x31b   :  { %1303 = vmatpush.msrb.mxu2 %v2554_v9 }
 0x31d   :  { %1304 = vmatpush.msrb.mxu2 %v2779_v57 }
 0x31f   :  { %1305 = vmatpush.msrb.mxu2 %v2785_v4 }
 0x321   :  { %1306 = vmatpush.msrb.mxu2 %v2791_v11 }
 0x323   :  { %1307 = vmatpush.msrb.mxu2 %v2796_v23 }
 0x325   :  { %1308 = vmatpush.msrb.mxu2 %v2803_v54 }
 0x327   :  { %1309 = vmatpush.msrb.mxu2 %v2820_v48 }
 0x329   :  { %1310 = vmatpush.msrb.mxu2 %v2829_v63 }
 0x32b   :  { %1311 = vmatpush.msrb.mxu2 %v2840_v10 }
 0x32d   :  { %1312 = vmatpush.msrb.mxu2 %v2848_v18 }
 0x32f   :  { %1313 = vmatpush.msrb.mxu2 %v2855_v15 }
 0x38e   :  { %v995_v58 = vpop.f32.mrf.mxu0 }
 0x38f   :  { %v1038_v30 = vadd.f32 %v2409_v22, %v995_v58  ;;  %v1536_v58 = vld [vmem:[%s3186_s6] sm:$0xff] }
 0x393   :  { %v955_v39 = vpop.f32.mrf.mxu2  ;;  %v975_v55 = vpop.f32.mrf.mxu3 }
 0x394   :  { %v998_v60 = vadd.f32 %v955_v39, %v2395_v52  ;;  %v1018_v1 = vadd.f32 %v975_v55, %v166_v38  ;;  %v1547_v38 = vld [vmem:[%s3186_s6 + $0x58] sm:$0xff] }
 0x396   :  { %v1621_v9 = vmul.f32 -1.442695, %v998_v60  ;;  %v1622_v7 = vmul.f32 -1.442695, %v1018_v1  ;;  %v1546_v60 = vld [vmem:[%s3186_s6 + $0x50] sm:$0xff] }
 0x398   :  { %1687 = vpow2.f32 %v1621_v9  ;;  %v1545_v9 = vld [vmem:[%s3186_s6 + $0x48] sm:$0xff] }
 0x399   :  { %1689 = vpow2.f32 %v1622_v7  ;;  %v169_v7 = vadd.f32 %v2427_v13, %v2403_v6  ;;  %v1541_v13 = vld [vmem:[%s3186_s6 + $0x28] sm:$0xff] }
 0x39e   :  { %v1688_v14 = vpop.eup %1687 }
 0x39f   :  { %v1690_v17 = vpop.eup %1689  ;;  %v1002_v21 = vadd.f32 1.0, %v1688_v14  ;;  %v1544_v14 = vld [vmem:[%s3186_s6 + $0x40] sm:$0xff] }
 0x3a0   :  { %v1022_v25 = vadd.f32 1.0, %v1690_v17 }
 0x3a1   :  { %1691 = vrcp.f32 %v1002_v21  ;;  %v1014_v5 = vand.u32 2147483648, %v1002_v21  ;;  %v1012_v52 = vand.u32 2147483647, %v1002_v21  ;;  %vm1008_vm1 = vweird.f32 %v1002_v21 }
 0x3a2   :  { %1693 = vrcp.f32 %v1022_v25  ;;  %v1034_v2 = vand.u32 2147483648, %v1022_v25  ;;  %vm1028_vm5 = vweird.f32 %v1022_v25  ;;  %v1032_v61 = vand.u32 2147483647, %v1022_v25 }
 0x3a3   :  { %v1015_v50 = vor.u32 1.1754944e-38, %v1014_v5  ;;  %vm1013_vm3 = vcmp.eq.f32.partialorder %v1012_v52, 8.507059e+37  ;;  %v1538_v5 = vld [vmem:[%s3186_s6 + $0x10] sm:$0xff] }
 0x3a4   :  { %v1035_v20 = vor.u32 1.1754944e-38, %v1034_v2  ;;  %vm1033_vm7 = vcmp.eq.f32.partialorder %v1032_v61, 8.507059e+37 }
 0x3a7   :  { %v1692_v44 = vpop.eup %1691 }
 0x3a8   :  { %v1694_v62 = vpop.eup %1693  ;;  %v1004_v16 = vmul.f32 %v1692_v44, %v1002_v21  ;;  %vm1009_vm0 = vweird.f32 %v1692_v44  ;;  %v1543_v21 = vld [vmem:[%s3186_s6 + $0x38] sm:$0xff] }
 0x3a9   :  { %v1024_v8 = vmul.f32 %v1694_v62, %v1022_v25  ;;  %vm1010_vm2 = vmor %vm1008_vm1, %vm1009_vm0  ;;  %vm1029_vm4 = vweird.f32 %v1694_v62 }
 0x3aa   :  { %v1005_v12 = vsub.f32 1.0, %v1004_v16  ;;  %vm1030_vm6 = vmor %vm1028_vm5, %vm1029_vm4  ;;  %v1540_v16 = vld [vmem:[%s3186_s6 + $0x20] sm:$0xff] }
 0x3ab   :  { %v1025_v41 = vsub.f32 1.0, %v1024_v8 }
 0x3ac   :  { %v1006_v26 = vmul.f32 %v1692_v44, %v1005_v12  ;;  %v1539_v12 = vld [vmem:[%s3186_s6 + $0x18] sm:$0xff] }
 0x3ad   :  { %v1026_v42 = vmul.f32 %v1694_v62, %v1025_v41 }
 0x3ae   :  { %v1007_v28 = vadd.f32 %v1692_v44, %v1006_v26  ;;  %v1537_v26 = vld [vmem:[%s3186_s6 + $0x8] sm:$0xff] }
 0x3af   :  { %v1027_v35 = vadd.f32 %v1694_v62, %v1026_v42 }
 0x3b0   :  { %v1011_v37 = vsel %vm1010_vm2, %v1692_v44, %v1007_v28  ;;  %v1542_v44 = vld [vmem:[%s3186_s6 + $0x30] sm:$0xff] }
 0x3b1   :  { %v1016_v56 = vsel %vm1013_vm3, %v1015_v50, %v1011_v37  ;;  %v1031_v31 = vsel %vm1030_vm6, %v1694_v62, %v1027_v35 }
 0x3b2   :  { %v1039_v53 = vmul.f32 %v1038_v30, %v1016_v56  ;;  %v1036_v47 = vsel %vm1033_vm7, %v1035_v20, %v1031_v31  ;;  %v2983_v20 = vld [vmem:[%s3184_s5] ss:$0 sm:$0xff] }
 0x3b3   :  { %v1042_v22 = vsub.f32 1.0, %v1036_v47  ;;  %v1044_v19 = vmul.f32 %v1036_v47, %v2895_v45 }
 0x3b4   :  { %v1040_v27 = vadd.f32 %v1039_v53, %v207_v46 }
 0x3b6   :  { %1695 = vtanh.f32 %v1040_v27 }
 0x3bc   :  { %v1696_v24 = vpop.eup %1695 }
 0x3bd   :  { %v1043_v3 = vmul.f32 %v1696_v24, %v1042_v22  ;;  %v3199_v22 = vld [vmem:[#allocation4_spill] sm:$0xff] }
 0x3be   :  { %v210_v24 = vadd.f32 %v3199_v22, %v2412_v33 }
 0x3bf   :  { %v2924_v0 = vadd.f32 %v1044_v19, %v1043_v3 }
 0x3c1   :  { %1114 = vmatmul.f32.vlgmr.msra.gmra.mxu1 %v2924_v0  ;;  %1134 = vmatmul.f32.vlgmr.msra.gmra.mxu2 %v2924_v0 }
 0x3c2   :  { %1154 = vmatmul.f32.vlgmr.msra.gmra.mxu3 %v2924_v0  ;;  %1556 = vmatpush.msra.mxu2 %v1551_v36 }
 0x3c4   :  { %1557 = vmatpush.msra.mxu2 %v1550_v34 }
 0x3c6   :  { %1558 = vmatpush.msra.mxu2 %v1549_v49 }
 0x3c8   :  { %1559 = vmatpush.msra.mxu2 %v1548_v51 }
 0x3ca   :  { %1560 = vmatpush.msra.mxu2 %v1547_v38 }
 0x3cc   :  { %1561 = vmatpush.msra.mxu2 %v1546_v60 }
 0x3ce   :  { %1562 = vmatpush.msra.mxu2 %v1545_v9 }
 0x3d0   :  { %1563 = vmatpush.msra.mxu2 %v1544_v14 }
 0x3d2   :  { %1564 = vmatpush.msra.mxu2 %v1543_v21  ;;  %v1415_v21 = vld [vmem:[%s3182_s3 + $0x168] sm:$0xff] }
 0x3d3   :  { %1418 = vmatpush.msrb.mxu3 %v1415_v21 }
 0x3d4   :  { %1565 = vmatpush.msra.mxu2 %v1542_v44  ;;  %v1409_v44 = vld [vmem:[%s3182_s3 + $0x138] sm:$0xff] }
 0x3d6   :  { %1566 = vmatpush.msra.mxu2 %v1541_v13  ;;  %v1410_v13 = vld [vmem:[%s3182_s3 + $0x140] sm:$0xff] }
 0x3d8   :  { %1567 = vmatpush.msra.mxu2 %v1540_v16  ;;  %v1406_v16 = vld [vmem:[%s3182_s3 + $0x120] sm:$0xff] }
 0x3da   :  { %1568 = vmatpush.msra.mxu2 %v1539_v12  ;;  %v1408_v12 = vld [vmem:[%s3182_s3 + $0x130] sm:$0xff] }
 0x3dc   :  { %1569 = vmatpush.msra.mxu2 %v1538_v5  ;;  %v1403_v5 = vld [vmem:[%s3182_s3 + $0x108] sm:$0xff] }
 0x3de   :  { %1570 = vmatpush.msra.mxu2 %v1537_v26  ;;  %v1405_v26 = vld [vmem:[%s3182_s3 + $0x118] sm:$0xff] }
 0x3e0   :  { %1571 = vmatpush.msra.mxu2 %v1536_v58  ;;  %v1401_v58 = vld [vmem:[%s3182_s3 + $0xf8] sm:$0xff] }
 0x43e   :  { %v1115_v39 = vpop.f32.mrf.mxu1 }
 0x43f   :  { %v1158_v55 = vadd.f32 %v1115_v39, %v2397_v59 }
 0x441   :  { %v1623_v1 = vmul.f32 -1.442695, %v1158_v55 }
 0x443   :  { %1697 = vpow2.f32 %v1623_v1 }
 0x444   :  { %v1135_v59 = vpop.f32.mrf.mxu2 }
 0x445   :  { %v1178_v17 = vadd.f32 %v1135_v59, %v169_v7  ;;  %v1155_v46 = vpop.f32.mrf.mxu3 }
 0x446   :  { %v1198_v47 = vadd.f32 %v2983_v20, %v1155_v46  ;;  %v1391_v46 = vld [vmem:[%s3182_s3 + $0xa8] sm:$0xff] }
 0x447   :  { %v1624_v25 = vmul.f32 -1.442695, %v1178_v17  ;;  %v3200_v17 = vld [vmem:[#allocation9_spill] sm:$0xff] }
 0x449   :  { %v1698_v62 = vpop.eup %1697  ;;  %1699 = vpow2.f32 %v1624_v25  ;;  %v1416_v25 = vld [vmem:[%s3182_s3 + $0x170] sm:$0xff] }
 0x44a   :  { %v1162_v8 = vadd.f32 1.0, %v1698_v62  ;;  %1438 = vmatpush.msra.mxu0 %v1416_v25  ;;  %v1411_v62 = vld [vmem:[%s3182_s3 + $0x148] sm:$0xff] }
 0x44c   :  { %1701 = vrcp.f32 %v1162_v8  ;;  %v1174_v30 = vand.u32 2147483648, %v1162_v8  ;;  %v1172_v56 = vand.u32 2147483647, %v1162_v8  ;;  %vm1168_vm9 = vweird.f32 %v1162_v8 }
 0x44e   :  { %v1175_v61 = vor.u32 1.1754944e-38, %v1174_v30  ;;  %vm1173_vm11 = vcmp.eq.f32.partialorder %v1172_v56, 8.507059e+37  ;;  %v1394_v30 = vld [vmem:[%s3182_s3 + $0xc0] sm:$0xff]  ;;  %v3201_v56 = vld [vmem:[#allocation10_spill] sm:$0xff] }
 0x44f   :  { %v1700_v41 = vpop.eup %1699 }
 0x450   :  { %v1182_v52 = vadd.f32 1.0, %v1700_v41  ;;  %v1404_v41 = vld [vmem:[%s3182_s3 + $0x110] sm:$0xff] }
 0x452   :  { %v1702_v42 = vpop.eup %1701  ;;  %1703 = vrcp.f32 %v1182_v52  ;;  %v1194_v36 = vand.u32 2147483648, %v1182_v52  ;;  %v1192_v49 = vand.u32 2147483647, %v1182_v52  ;;  %vm1188_vm13 = vweird.f32 %v1182_v52 }
 0x453   :  { %v1164_v28 = vmul.f32 %v1702_v42, %v1162_v8  ;;  %vm1169_vm8 = vweird.f32 %v1702_v42  ;;  %v1407_v8 = vld [vmem:[%s3182_s3 + $0x128] sm:$0xff] }
 0x454   :  { %vm1170_vm10 = vmor %vm1168_vm9, %vm1169_vm8  ;;  %v1195_v39 = vor.u32 1.1754944e-38, %v1194_v36  ;;  %vm1193_vm15 = vcmp.eq.f32.partialorder %v1192_v49, 8.507059e+37  ;;  %v1376_v49 = vld [vmem:[%s3182_s3 + $0x30] sm:$0xff] }
 0x455   :  { %v1165_v50 = vsub.f32 1.0, %v1164_v28  ;;  %v1397_v28 = vld [vmem:[%s3182_s3 + $0xd8] sm:$0xff] }
 0x457   :  { %v1166_v37 = vmul.f32 %v1702_v42, %v1165_v50  ;;  %v1398_v50 = vld [vmem:[%s3182_s3 + $0xe0] sm:$0xff] }
 0x458   :  { %v1704_v35 = vpop.eup %1703 }
 0x459   :  { %v1184_v53 = vmul.f32 %v1704_v35, %v1182_v52  ;;  %v1167_v2 = vadd.f32 %v1702_v42, %v1166_v37  ;;  %vm1189_vm12 = vweird.f32 %v1704_v35  ;;  %v1400_v52 = vld [vmem:[%s3182_s3 + $0xf0] sm:$0xff]  ;;  %v1395_v37 = vld [vmem:[%s3182_s3 + $0xc8] sm:$0xff] }
 0x45a   :  { %vm1190_vm14 = vmor %vm1188_vm13, %vm1189_vm12 }
 0x45b   :  { %v1185_v27 = vsub.f32 1.0, %v1184_v53  ;;  %v1171_v31 = vsel %vm1170_vm10, %v1702_v42, %v1167_v2  ;;  %v1402_v42 = vld [vmem:[%s3182_s3 + $0x100] sm:$0xff] }
 0x45c   :  { %v1176_v3 = vsel %vm1173_vm11, %v1175_v61, %v1171_v31  ;;  %v3202_v61 = vld [vmem:[#allocation7_spill] sm:$0xff] }
 0x45d   :  { %v1186_v19 = vmul.f32 %v1704_v35, %v1185_v27  ;;  %v1199_v34 = vmul.f32 %v1198_v47, %v1176_v3  ;;  %v1389_v47 = vld [vmem:[%s3182_s3 + $0x98] sm:$0xff] }
 0x45e   :  { %v1385_v3 = vld [vmem:[%s3182_s3 + $0x78] sm:$0xff] }
 0x45f   :  { %v1187_v51 = vadd.f32 %v1704_v35, %v1186_v19  ;;  %v1200_v38 = vadd.f32 %v1199_v34, %v210_v24  ;;  %v1382_v19 = vld [vmem:[%s3182_s3 + $0x60] sm:$0xff]  ;;  %v1379_v34 = vld [vmem:[%s3182_s3 + $0x48] sm:$0xff] }
 0x461   :  { %v1191_v55 = vsel %vm1190_vm14, %v1704_v35, %v1187_v51  ;;  %1705 = vtanh.f32 %v1200_v38  ;;  %v172_v35 = vadd.f32 %v3201_v56, %v2403_v6  ;;  %v1373_v51 = vld [vmem:[%s3182_s3 + $0x18] sm:$0xff] }
 0x462   :  { %v1196_v60 = vsel %vm1193_vm15, %v1195_v39, %v1191_v55 }
 0x463   :  { %v1202_v1 = vsub.f32 1.0, %v1196_v60  ;;  %v1204_v14 = vmul.f32 %v1196_v60, %v2924_v0  ;;  %v3122_v60 = vld [vmem:[%s3187_s7] ss:$0 sm:$0xff] }
 0x467   :  { %v1706_v9 = vpop.eup %1705 }
 0x468   :  { %v1203_v7 = vmul.f32 %v1706_v9, %v1202_v1 }
 0x46a   :  { %v2989_v59 = vadd.f32 %v1204_v14, %v1203_v7 }
 0x46c   :  { %1274 = vmatmul.f32.vlgmr.msrb.gmra.mxu0 %v2989_v59  ;;  %1294 = vmatmul.f32.vlgmr.msrb.gmra.mxu1 %v2989_v59 }
 0x46d   :  { %1314 = vmatmul.f32.vlgmr.msrb.gmra.mxu2 %v2989_v59 }
 0x475   :  { %1572 = vmatmul.f32.vlgmr.msra.gmra.mxu2 %v3200_v17 }
 0x47d   :  { %1575 = vmatmul.f32.gmra.mxu2 %v2442_v32  ;;  %v1417_v32 = vld [vmem:[%s3182_s3 + $0x178] sm:$0xff] }
 0x47e   :  { %1458 = vmatpush.msra.mxu1 %v1417_v32 }
 0x485   :  { %1578 = vmatmul.f32.gmra.mxu2 %v2752_v43  ;;  %v1412_v43 = vld [vmem:[%s3182_s3 + $0x150] sm:$0xff] }
 0x486   :  { %1419 = vmatpush.msrb.mxu3 %v1412_v43 }
 0x488   :  { %1420 = vmatpush.msrb.mxu3 %v1409_v44 }
 0x48a   :  { %1421 = vmatpush.msrb.mxu3 %v1406_v16 }
 0x48c   :  { %1422 = vmatpush.msrb.mxu3 %v1403_v5 }
 0x48d   :  { %1581 = vmatmul.f32.gmra.mxu2 %v2895_v45  ;;  %v1413_v45 = vld [vmem:[%s3182_s3 + $0x158] sm:$0xff] }
 0x48e   :  { %1439 = vmatpush.msra.mxu0 %v1413_v45  ;;  %1423 = vmatpush.msrb.mxu3 %v1400_v52 }
 0x490   :  { %1440 = vmatpush.msra.mxu0 %v1410_v13  ;;  %1424 = vmatpush.msrb.mxu3 %v1397_v28 }
 0x492   :  { %1441 = vmatpush.msra.mxu0 %v1407_v8  ;;  %1425 = vmatpush.msrb.mxu3 %v1394_v30 }
 0x494   :  { %1442 = vmatpush.msra.mxu0 %v1404_v41  ;;  %1426 = vmatpush.msrb.mxu3 %v1391_v46 }
 0x495   :  { %1584 = vmatmul.f32.gmra.mxu2 %v2924_v0  ;;  %v1414_v0 = vld [vmem:[%s3182_s3 + $0x160] sm:$0xff] }
 0x496   :  { %1459 = vmatpush.msra.mxu1 %v1414_v0  ;;  %1443 = vmatpush.msra.mxu0 %v1401_v58 }
 0x498   :  { %1460 = vmatpush.msra.mxu1 %v1411_v62  ;;  %1444 = vmatpush.msra.mxu0 %v1398_v50 }
 0x49a   :  { %1461 = vmatpush.msra.mxu1 %v1408_v12  ;;  %1445 = vmatpush.msra.mxu0 %v1395_v37  ;;  %v3203_v12 = vld [vmem:[#allocation5_spill] sm:$0xff] }
 0x49b   :  { %v213_v5 = vadd.f32 %v3203_v12, %v2412_v33 }
 0x49c   :  { %1462 = vmatpush.msra.mxu1 %v1405_v26 }
 0x49d   :  { %1587 = vmatmul.f32.gmra.mxu2 %v2989_v59 }
 0x49e   :  { %1463 = vmatpush.msra.mxu1 %v1402_v42 }
 0x4a0   :  { %1464 = vmatpush.msra.mxu1 %v2779_v57  ;;  %v1392_v57 = vld [vmem:[%s3182_s3 + $0xb0] sm:$0xff] }
 0x4a1   :  { %1446 = vmatpush.msra.mxu0 %v1392_v57 }
 0x4a2   :  { %1465 = vmatpush.msra.mxu1 %v2785_v4  ;;  %v1388_v4 = vld [vmem:[%s3182_s3 + $0x90] sm:$0xff] }
 0x4a3   :  { %1427 = vmatpush.msrb.mxu3 %v1388_v4  ;;  %1447 = vmatpush.msra.mxu0 %v1389_v47  ;;  %v3204_v47 = vld [vmem:[#allocation11_spill] sm:$0xff] }
 0x4a4   :  { %1466 = vmatpush.msra.mxu1 %v2791_v11  ;;  %v1386_v11 = vld [vmem:[%s3182_s3 + $0x80] sm:$0xff] }
 0x4a5   :  { %1428 = vmatpush.msrb.mxu3 %v1385_v3  ;;  %1448 = vmatpush.msra.mxu0 %v1386_v11 }
 0x4a6   :  { %1467 = vmatpush.msra.mxu1 %v2796_v23  ;;  %v1383_v23 = vld [vmem:[%s3182_s3 + $0x68] sm:$0xff] }
 0x4a7   :  { %1429 = vmatpush.msrb.mxu3 %v1382_v19  ;;  %1449 = vmatpush.msra.mxu0 %v1383_v23  ;;  %v3205_v23 = vld [vmem:[#allocation8_spill] sm:$0xff] }
 0x4a8   :  { %1468 = vmatpush.msra.mxu1 %v2803_v54  ;;  %v1380_v54 = vld [vmem:[%s3182_s3 + $0x50] sm:$0xff] }
 0x4a9   :  { %1430 = vmatpush.msrb.mxu3 %v1379_v34  ;;  %1450 = vmatpush.msra.mxu0 %v1380_v54 }
 0x4aa   :  { %1469 = vmatpush.msra.mxu1 %v2820_v48  ;;  %v1377_v48 = vld [vmem:[%s3182_s3 + $0x38] sm:$0xff] }
 0x4ab   :  { %1431 = vmatpush.msrb.mxu3 %v1376_v49  ;;  %1451 = vmatpush.msra.mxu0 %v1377_v48 }
 0x4ac   :  { %1470 = vmatpush.msra.mxu1 %v2829_v63  ;;  %v1370_v63 = vld [vmem:[%s3182_s3] sm:$0xff] }
 0x4ad   :  { %1432 = vmatpush.msrb.mxu3 %v1373_v51  ;;  %1452 = vmatpush.msra.mxu0 %v2808_v29 }
 0x4ae   :  { %1471 = vmatpush.msra.mxu1 %v2840_v10 }
 0x4af   :  { %1433 = vmatpush.msrb.mxu3 %v1370_v63  ;;  %1453 = vmatpush.msra.mxu0 %v2813_v40 }
 0x4b0   :  { %1472 = vmatpush.msra.mxu1 %v2848_v18 }
 0x4b2   :  { %1473 = vmatpush.msra.mxu1 %v2855_v15 }
 0x4e9   :  { %v1275_v53 = vpop.f32.mrf.mxu0  ;;  %v1295_v2 = vpop.f32.mrf.mxu1 }
 0x4ea   :  { %v1318_v27 = vadd.f32 %v1275_v53, %v3202_v61  ;;  %v1338_v31 = vadd.f32 %v1295_v2, %v172_v35 }
 0x4ec   :  { %v1625_v22 = vmul.f32 -1.442695, %v1318_v27  ;;  %v1626_v24 = vmul.f32 -1.442695, %v1338_v31 }
 0x4ee   :  { %1707 = vpow2.f32 %v1625_v22  ;;  %v175_v22 = vadd.f32 %v3204_v47, %v2403_v6 }
 0x4ef   :  { %1709 = vpow2.f32 %v1626_v24 }
 0x4f0   :  { %v1315_v36 = vpop.f32.mrf.mxu2 }
 0x4f1   :  { %v1358_v62 = vadd.f32 %v2983_v20, %v1315_v36 }
 0x4f4   :  { %v1708_v38 = vpop.eup %1707 }
 0x4f5   :  { %v1710_v39 = vpop.eup %1709  ;;  %v1322_v55 = vadd.f32 1.0, %v1708_v38 }
 0x4f6   :  { %v1342_v1 = vadd.f32 1.0, %v1710_v39 }
 0x4f7   :  { %1711 = vrcp.f32 %v1322_v55  ;;  %v1334_v32 = vand.u32 2147483648, %v1322_v55  ;;  %v1332_v45 = vand.u32 2147483647, %v1322_v55  ;;  %vm1328_vm1 = vweird.f32 %v1322_v55 }
 0x4f8   :  { %1713 = vrcp.f32 %v1342_v1  ;;  %v1573_v10 = vpop.f32.mrf.mxu2  ;;  %v1354_v41 = vand.u32 2147483648, %v1342_v1  ;;  %vm1348_vm5 = vweird.f32 %v1342_v1  ;;  %v1352_v58 = vand.u32 2147483647, %v1342_v1 }
 0x4f9   :  { %v1574_v9 = vadd.f32 %v3122_v60, %v1573_v10  ;;  %v1335_v44 = vor.u32 1.1754944e-38, %v1334_v32  ;;  %vm1333_vm3 = vcmp.eq.f32.partialorder %v1332_v45, 8.507059e+37 }
 0x4fa   :  { %v1355_v30 = vor.u32 1.1754944e-38, %v1354_v41  ;;  %vm1353_vm7 = vcmp.eq.f32.partialorder %v1352_v58, 8.507059e+37 }
 0x4fb   :  { %1597 = vst [vmem:[%s3188_s8] sm:$0xff] %v1574_v9 }
 0x4fd   :  { %v1712_v7 = vpop.eup %1711 }
 0x4fe   :  { %v1714_v14 = vpop.eup %1713  ;;  %v1324_v29 = vmul.f32 %v1712_v7, %v1322_v55  ;;  %vm1329_vm0 = vweird.f32 %v1712_v7 }
 0x4ff   :  { %v1344_v17 = vmul.f32 %v1714_v14, %v1342_v1  ;;  %vm1330_vm2 = vmor %vm1328_vm1, %vm1329_vm0  ;;  %vm1349_vm4 = vweird.f32 %v1714_v14 }
 0x500   :  { %v1325_v21 = vsub.f32 1.0, %v1324_v29  ;;  %v1576_v18 = vpop.f32.mrf.mxu2  ;;  %vm1350_vm6 = vmor %vm1348_vm5, %vm1349_vm4 }
 0x501   :  { %v1345_v25 = vsub.f32 1.0, %v1344_v17  ;;  %v1577_v40 = vadd.f32 %v3122_v60, %v1576_v18 }
 0x502   :  { %v1326_v43 = vmul.f32 %v1712_v7, %v1325_v21 }
 0x503   :  { %v1346_v15 = vmul.f32 %v1714_v14, %v1345_v25  ;;  %1598 = vst [vmem:[%s3188_s8 + $0x8] sm:$0xff] %v1577_v40 }
 0x504   :  { %v1327_v0 = vadd.f32 %v1712_v7, %v1326_v43 }
 0x505   :  { %v1347_v16 = vadd.f32 %v1714_v14, %v1346_v15  ;;  %v3206_v15 = vld [vmem:[#allocation6_spill] sm:$0xff] }
 0x506   :  { %v1331_v13 = vsel %vm1330_vm2, %v1712_v7, %v1327_v0  ;;  %v216_v0 = vadd.f32 %v3206_v15, %v2412_v33 }
 0x507   :  { %v1336_v8 = vsel %vm1333_vm3, %v1335_v44, %v1331_v13  ;;  %v1351_v50 = vsel %vm1350_vm6, %v1714_v14, %v1347_v16 }
 0x508   :  { %v1359_v26 = vmul.f32 %v1358_v62, %v1336_v8  ;;  %v1579_v52 = vpop.f32.mrf.mxu2  ;;  %v1356_v37 = vsel %vm1353_vm7, %v1355_v30, %v1351_v50 }
 0x509   :  { %v1580_v42 = vadd.f32 %v3122_v60, %v1579_v52  ;;  %v1362_v35 = vsub.f32 1.0, %v1356_v37  ;;  %v1364_v2 = vmul.f32 %v1356_v37, %v2989_v59 }
 0x50a   :  { %v1360_v28 = vadd.f32 %v1359_v26, %v213_v5 }
 0x50b   :  { %1599 = vst [vmem:[%s3188_s8 + $0x10] sm:$0xff] %v1580_v42 }
 0x50c   :  { %1715 = vtanh.f32 %v1360_v28 }
 0x510   :  { %v1582_v56 = vpop.f32.mrf.mxu2 }
 0x511   :  { %v1583_v46 = vadd.f32 %v3122_v60, %v1582_v56 }
 0x512   :  { %v1716_v57 = vpop.eup %1715 }
 0x513   :  { %v1363_v53 = vmul.f32 %v1716_v57, %v1362_v35  ;;  %1600 = vst [vmem:[%s3188_s8 + $0x18] sm:$0xff] %v1583_v46 }
 0x515   :  { %v3148_v61 = vadd.f32 %v1364_v2, %v1363_v53 }
 0x517   :  { %1434 = vmatmul.f32.vlgmr.msrb.gmra.mxu3 %v3148_v61  ;;  %1454 = vmatmul.f32.vlgmr.msra.gmra.mxu0 %v3148_v61 }
 0x518   :  { %1474 = vmatmul.f32.vlgmr.msra.gmra.mxu1 %v3148_v61  ;;  %v1585_v27 = vpop.f32.mrf.mxu2  ;;  %1590 = vmatmul.f32.gmra.mxu2 %v3148_v61 }
 0x519   :  { %v1586_v31 = vadd.f32 %v3122_v60, %v1585_v27 }
 0x51b   :  { %1601 = vst [vmem:[%s3188_s8 + $0x20] sm:$0xff] %v1586_v31 }
 0x520   :  { %v1588_v4 = vpop.f32.mrf.mxu2 }
 0x521   :  { %v1589_v59 = vadd.f32 %v3122_v60, %v1588_v4 }
 0x523   :  { %1602 = vst [vmem:[%s3188_s8 + $0x28] sm:$0xff] %v1589_v59 }
 0x594   :  { %v1455_v24 = vpop.f32.mrf.mxu0 }
 0x595   :  { %v1498_v3 = vadd.f32 %v1455_v24, %v175_v22  ;;  %v1475_v17 = vpop.f32.mrf.mxu1 }
 0x596   :  { %v1518_v32 = vadd.f32 %v2983_v20, %v1475_v17 }
 0x597   :  { %v1628_v11 = vmul.f32 -1.442695, %v1498_v3 }
 0x599   :  { %1717 = vpow2.f32 %v1628_v11 }
 0x59a   :  { %v1435_v19 = vpop.f32.mrf.mxu3 }
 0x59b   :  { %v1478_v36 = vadd.f32 %v1435_v19, %v3205_v23  ;;  %v1591_v34 = vpop.f32.mrf.mxu2 }
 0x59c   :  { %v1592_v54 = vadd.f32 %v3122_v60, %v1591_v34 }
 0x59d   :  { %v1627_v49 = vmul.f32 -1.442695, %v1478_v36 }
 0x59e   :  { %1603 = vst [vmem:[%s3188_s8 + $0x30] sm:$0xff] %v1592_v54 }
 0x59f   :  { %v1718_v48 = vpop.eup %1717  ;;  %1719 = vpow2.f32 %v1627_v49 }
 0x5a0   :  { %v1502_v51 = vadd.f32 1.0, %v1718_v48 }
 0x5a2   :  { %1721 = vrcp.f32 %v1502_v51  ;;  %v1514_v44 = vand.u32 2147483648, %v1502_v51  ;;  %vm1508_vm13 = vweird.f32 %v1502_v51  ;;  %v1512_v62 = vand.u32 2147483647, %v1502_v51 }
 0x5a4   :  { %v1515_v12 = vor.u32 1.1754944e-38, %v1514_v44  ;;  %vm1513_vm15 = vcmp.eq.f32.partialorder %v1512_v62, 8.507059e+37 }
 0x5a5   :  { %v1720_v6 = vpop.eup %1719 }
 0x5a6   :  { %v1482_v38 = vadd.f32 1.0, %v1720_v6 }
 0x5a8   :  { %1723 = vrcp.f32 %v1482_v38  ;;  %v1722_v63 = vpop.eup %1721  ;;  %v1494_v7 = vand.u32 2147483648, %v1482_v38  ;;  %v1492_v29 = vand.u32 2147483647, %v1482_v38  ;;  %vm1488_vm9 = vweird.f32 %v1482_v38 }
 0x5a9   :  { %v1504_v39 = vmul.f32 %v1722_v63, %v1502_v51  ;;  %vm1509_vm12 = vweird.f32 %v1722_v63 }
 0x5aa   :  { %v1495_v25 = vor.u32 1.1754944e-38, %v1494_v7  ;;  %vm1493_vm11 = vcmp.eq.f32.partialorder %v1492_v29, 8.507059e+37  ;;  %vm1510_vm14 = vmor %vm1508_vm13, %vm1509_vm12 }
 0x5ab   :  { %v1505_v10 = vsub.f32 1.0, %v1504_v39 }
 0x5ad   :  { %v1506_v21 = vmul.f32 %v1722_v63, %v1505_v10 }
 0x5ae   :  { %v1724_v55 = vpop.eup %1723 }
 0x5af   :  { %v1484_v1 = vmul.f32 %v1724_v55, %v1482_v38  ;;  %vm1489_vm8 = vweird.f32 %v1724_v55  ;;  %v1507_v45 = vadd.f32 %v1722_v63, %v1506_v21 }
 0x5b0   :  { %vm1490_vm10 = vmor %vm1488_vm9, %vm1489_vm8 }
 0x5b1   :  { %v1485_v9 = vsub.f32 1.0, %v1484_v1  ;;  %v1511_v8 = vsel %vm1510_vm14, %v1722_v63, %v1507_v45 }
 0x5b2   :  { %v1516_v5 = vsel %vm1513_vm15, %v1515_v12, %v1511_v8 }
 0x5b3   :  { %v1486_v14 = vmul.f32 %v1724_v55, %v1485_v9  ;;  %v1522_v20 = vsub.f32 1.0, %v1516_v5  ;;  %v1524_v52 = vmul.f32 %v1516_v5, %v3148_v61 }
 0x5b5   :  { %v1487_v18 = vadd.f32 %v1724_v55, %v1486_v14 }
 0x5b7   :  { %v1491_v40 = vsel %vm1490_vm10, %v1724_v55, %v1487_v18 }
 0x5b8   :  { %v1496_v43 = vsel %vm1493_vm11, %v1495_v25, %v1491_v40 }
 0x5b9   :  { %v1519_v13 = vmul.f32 %v1518_v32, %v1496_v43 }
 0x5bb   :  { %v1520_v16 = vadd.f32 %v1519_v13, %v216_v0 }
 0x5bd   :  { %1725 = vtanh.f32 %v1520_v16 }
 0x5c3   :  { %v1726_v41 = vpop.eup %1725 }
 0x5c4   :  { %v1523_v26 = vmul.f32 %v1726_v41, %v1522_v20 }
 0x5c6   :  { %v1525_v58 = vadd.f32 %v1524_v52, %v1523_v26 }
 0x5c8   :  { %1527 = vst [vmem:[%s3189_s9] sm:$0xff] %v1525_v58  ;;  %1593 = vmatmul.f32.gmra.mxu2 %v1525_v58 }
 0x64b   :  { %v1594_v33 = vpop.f32.mrf.mxu2 }
 0x64c   :  { %v1595_v42 = vadd.f32 %v3122_v60, %v1594_v33 }
 0x64e   :  { %1604 = vst [vmem:[%s3188_s8 + $0x38] sm:$0xff] %v1595_v42 }

</bundles_post_ra>
